<compile_context>
chip_gen: v5e
topology: v5e:2x2
jax: 0.10.0
libtpu: 0.0.40
codegen_flags: <defaults>
</compile_context>

<pallas_src>
import functools
import numpy as np
import jax
import jax.numpy as jnp
from jax.experimental import pallas as pl
from jax.experimental.pallas import tpu as pltpu

# ----------------------------- module hyper-params -----------------------------
N_WORD = 16          # word-embedding size
N_H = 32             # N_h  (must be even; encoder hidden = N_h // 2 per direction)
N_DEPTH = 2          # num LSTM layers (original code's hid[:2]/hid[2:] assumes 2)
MAX_TOK_NUM = 400    # hard-coded in the PyTorch module
START_END = (0, 1)

# ----------------------------- deterministic params -----------------------------
_key_state = [jax.random.PRNGKey(0)]


def _next_key():
    _key_state[0], sub = jax.random.split(_key_state[0])
    return sub


def _uni(shape, bound):
    return jax.random.uniform(_next_key(), shape, jnp.float32, -bound, bound)


def _lstm_dir_params(in_dim, hid):
    b = 1.0 / np.sqrt(hid)
    return (_uni((4 * hid, in_dim), b),   # w_ih
            _uni((4 * hid, hid), b),      # w_hh
            _uni((4 * hid,), b),          # b_ih
            _uni((4 * hid,), b))          # b_hh


def init_params():
    hd = N_H // 2
    enc = []
    for l in range(N_DEPTH):
        in_dim = N_WORD if l == 0 else 2 * hd
        enc.append({'fwd': _lstm_dir_params(in_dim, hd),
                    'bwd': _lstm_dir_params(in_dim, hd)})
    dec = []
    for l in range(N_DEPTH):
        in_dim = MAX_TOK_NUM if l == 0 else N_H
        dec.append(_lstm_dir_params(in_dim, N_H))
    bl = 1.0 / np.sqrt(N_H)
    return dict(
        enc=enc, dec=dec,
        Wh=_uni((N_H, N_H), bl), bh=_uni((N_H,), bl),      # seq_out_h
        Wg=_uni((N_H, N_H), bl), bg=_uni((N_H,), bl),      # seq_out_g
        v=_uni((1, N_H), bl), c=_uni((1,), bl),            # seq_out Linear(N_h, 1)
    )


# ----------------------------- plain-JAX LSTM glue -----------------------------
# TODO(synk): these sequential lax.scan LSTMs (one batched (B, 4H) gate matmul per step)
# are recurrent, tiny compute and are intentionally left outside the Pallas kernel.
def _lstm_cell(xt, h, c, w_ih, w_hh, b_ih, b_hh):
    gates = xt @ w_ih.T + h @ w_hh.T + b_ih + b_hh
    i, f, g, o = jnp.split(gates, 4, axis=-1)
    i, f, o = jax.nn.sigmoid(i), jax.nn.sigmoid(f), jax.nn.sigmoid(o)
    g = jnp.tanh(g)
    c_new = f * c + i * g
    h_new = o * jnp.tanh(c_new)
    return h_new, c_new


def _run_dir(x, lengths, params, h0, c0, reverse=False):
    """Single-direction LSTM with packed-sequence semantics (freeze state / zero
    outputs past each sequence's length)."""
    _, T, _ = x.shape

    def step(carry, t):
        h, c = carry
        xt = x[:, t, :]
        h_new, c_new = _lstm_cell(xt, h, c, *params)
        m = (t < lengths)[:, None]
        h = jnp.where(m, h_new, h)
        c = jnp.where(m, c_new, c)
        out = jnp.where(m, h_new, 0.0)
        return (h, c), out

    ts = jnp.arange(T)
    if reverse:
        ts = ts[::-1]
    (h, c), outs = jax.lax.scan(step, (h0, c0), ts)
    if reverse:
        outs = outs[::-1]
    return jnp.transpose(outs, (1, 0, 2)), (h, c)


def run_enc_lstm(x, lengths, enc_params):
    """Bidirectional, N_DEPTH-layer encoder (run_lstm equivalent, eval / no dropout)."""
    B = x.shape[0]
    hs, cs = [], []
    inp = x
    for layer in enc_params:
        hd = layer['fwd'][1].shape[1]
        z = jnp.zeros((B, hd), jnp.float32)
        out_f, (hf, cf) = _run_dir(inp, lengths, layer['fwd'], z, z, reverse=False)
        out_b, (hb, cb) = _run_dir(inp, lengths, layer['bwd'], z, z, reverse=True)
        inp = jnp.concatenate([out_f, out_b], axis=-1)
        hs += [hf, hb]
        cs += [cf, cb]
    return inp, (jnp.stack(hs), jnp.stack(cs))   # h_n/c_n: (2*N_DEPTH, B, N_H//2)


def run_dec_lstm(x, lengths, dec_params, h0_stack, c0_stack):
    inp = x
    for l, layer in enumerate(dec_params):
        inp, _ = _run_dir(inp, lengths, layer, h0_stack[l], c0_stack[l], reverse=False)
    return inp


def gen_gt_batch(tok_seqs):
    """One-hot (B, max_len, MAX_TOK_NUM) of seq[:-1], like the PyTorch gen_gt_batch."""
    B = len(tok_seqs)
    lens = np.array([len(s) - 1 for s in tok_seqs], dtype=np.int32)
    max_len = int(lens.max())
    arr = np.zeros((B, max_len, MAX_TOK_NUM), dtype=np.float32)
    for b, s in enumerate(tok_seqs):
        for t, tok in enumerate(s[:-1]):
            arr[b, t, tok] = 1.0
    return jnp.asarray(arr), jnp.asarray(lens)


# ----------------------------- TPU-generation helpers -----------------------------
def _tpu_kind():
    try:
        return jax.devices()[0].device_kind.lower()
    except Exception:
        return ""


def _has_two_tensorcores(kind):
    # v7x has 2 TensorCores per chip; v5e/v6e have 1.
    return ("v7" in kind) or ("7x" in kind)


def _use_bf16_tanh(kind):
    # bf16 EUP/VPU exist on v6e / v7x; v5e (and older) have no bf16 EUP -> keep f32.
    return ("v6" in kind) or _has_two_tensorcores(kind)


def _round_up(a, m):
    return ((a + m - 1) // m) * m


# ----------------------------- Pallas pointer-score kernel -----------------------------
def _score_kernel(xlen_ref, vcb_ref, hencT_ref, gs2d_ref, wh_ref, wgT_ref,
                  out_ref, gg_ref, *, Bb, X_pad, T_pad, TC, H, compute_dtype):
    """Pointer scores for one batch chunk (Bb rows) per grid step.

    hencT_ref : (Bb*H, X_pad)   row b*H + k     holds h_enc[b, :, k]   (x lane-dense)
    gs2d_ref  : (Bb*T_pad, H)   row b*T_pad + t holds g_s[b, t, :]     (natural layout)
    wh_ref    : (H, H)          seq_out_h weight, un-transposed (used as Wh @ h_enc_b^T)
    wgT_ref   : (H, H)          seq_out_g weight transposed (used as g_s @ Wg^T)
    xlen_ref  : SMEM (B_pad,)  int32
    vcb_ref   : SMEM (2H+1,)   f32 = [v(0:H), bh+bg(H:2H), c]
    out_ref   : (Bb*T_pad, X_pad)
    gg_ref    : VMEM scratch (Bb*T_pad, H) f32
    """
    chunk = pl.program_id(0)
    n_tc = T_pad // TC

    # Decoder-side projection for the whole chunk: ONE MXU matmul per grid step
    # (bg is folded with bh into the SMEM scalar vector, applied per-h below).
    gg_ref[...] = jnp.dot(gs2d_ref[...], wgT_ref[...],
                          preferred_element_type=jnp.float32)

    c = vcb_ref[2 * H]
    neg100 = jnp.float32(-100.0)
    # Hoisted out of all loops: lane-index iota and the accumulator base tile (= bias c).
    xidx = jax.lax.broadcasted_iota(jnp.int32, (TC, X_pad), 1)
    c_tile = jnp.full((TC, X_pad), c, dtype=jnp.float32)

    def b_body(b, carry):
        xlen_b = xlen_ref[chunk * Bb + b]
        mask = xidx < xlen_b                                     # (TC, X_pad), per b only
        # Encoder-side projection for this batch row: (H, X_pad), full-128-lane MXU work.
        henc_b = hencT_ref[pl.ds(pl.multiple_of(b * H, H), H), :]
        hh_b = jnp.dot(wh_ref[...], henc_b, preferred_element_type=jnp.float32)

        def tc_body(tc, carry2):
            t0 = pl.multiple_of(b * T_pad + tc * TC, TC)
            gg_c = gg_ref[pl.ds(t0, TC), :]                      # (TC, H) f32
            acc = c_tile
            # Fused v-projection: each per-h (TC, X_pad) tanh tile is consumed
            # immediately; the (H, TC, X_pad) intermediate is never materialized.
            for h in range(H):                                   # short static unroll
                row = hh_b[h:h + 1, :] + vcb_ref[H + h]          # (1, X_pad) f32, bias fused
                arg = (gg_c[:, h:h + 1] + row).astype(compute_dtype)
                acc = acc + vcb_ref[h] * jnp.tanh(arg)           # bf16 tanh (v6e/v7x), f32 acc
            out_ref[pl.ds(t0, TC), :] = jnp.where(mask, acc, neg100)
            return carry2

        jax.lax.fori_loop(0, n_tc, tc_body, 0)
        return carry

    jax.lax.fori_loop(0, Bb, b_body, 0)


def pointer_scores(h_enc, g_s, x_len, Wh, bh, Wg, bg, v, c):
    B, X, H = h_enc.shape
    T = g_s.shape[1]
    f32 = jnp.float32

    X_pad = _round_up(max(X, 1), 128)            # lane-dense output stores
    TC = min(_round_up(max(T, 1), 8), 32)        # decoder-step chunk (sublane multiple)
    T_pad = _round_up(max(T, 1), TC)

    kind = _tpu_kind()
    two_tc = _has_two_tensorcores(kind)
    compute_dtype = jnp.bfloat16 if _use_bf16_tanh(kind) else jnp.float32

    # Chunking: v5e/v6e (single TC) -> as few grid steps as possible (grid steps only add
    # per-step overhead); v7x (2 TCs) -> an even number of >=2 chunks so both cores are
    # loaded equally by the "parallel" axis.
    if B <= 1:
        Bb, chunks = max(B, 1), 1
    elif two_tc:
        chunks = 2
        while -(-B // chunks) > 8:
            chunks += 2
        Bb = -(-B // chunks)
    else:
        chunks = -(-B // 8)
        Bb = -(-B // chunks)
    B_pad = Bb * chunks

    # Wrapper-side layout plumbing: pad, and transpose ONLY the encoder side (x must be
    # lane-dense).  The decoder side keeps its natural (B, T, H) layout (reshape only).
    henc_p = jnp.zeros((B_pad, X_pad, H), f32).at[:B, :X, :].set(h_enc.astype(f32))
    gs_p = jnp.zeros((B_pad, T_pad, H), f32).at[:B, :T, :].set(g_s.astype(f32))
    hencT = jnp.transpose(henc_p, (0, 2, 1)).reshape(B_pad * H, X_pad)   # (B_pad*H, X_pad)
    gs2d = gs_p.reshape(B_pad * T_pad, H)                                # (B_pad*T_pad, H)
    xlen_p = jnp.zeros((B_pad,), jnp.int32).at[:B].set(x_len.astype(jnp.int32))
    vcb = jnp.concatenate([v.reshape(-1), (bh + bg).reshape(-1),
                           c.reshape(-1)]).astype(f32)                   # (2H+1,) -> SMEM

    kernel = functools.partial(_score_kernel, Bb=Bb, X_pad=X_pad, T_pad=T_pad,
                               TC=TC, H=H, compute_dtype=compute_dtype)
    grid_spec = pltpu.PrefetchScalarGridSpec(
        num_scalar_prefetch=2,                  # x_len (int32) and [v, bh+bg, c] (f32)
        grid=(chunks,),
        in_specs=[
            pl.BlockSpec((Bb * H, X_pad), lambda ci, *_: (ci, 0)),       # h_enc^T chunk
            pl.BlockSpec((Bb * T_pad, H), lambda ci, *_: (ci, 0)),       # g_s chunk (natural)
            pl.BlockSpec((H, H), lambda ci, *_: (0, 0)),                 # Wh
            pl.BlockSpec((H, H), lambda ci, *_: (0, 0)),                 # Wg^T
        ],
        out_specs=pl.BlockSpec((Bb * T_pad, X_pad), lambda ci, *_: (ci, 0)),
        scratch_shapes=[pltpu.VMEM((Bb * T_pad, H), f32)],               # gg scratch
    )
    out = pl.pallas_call(
        kernel,
        out_shape=jax.ShapeDtypeStruct((B_pad * T_pad, X_pad), f32),
        grid_spec=grid_spec,
        compiler_params=pltpu.CompilerParams(
            dimension_semantics=("parallel",),
            # Blocks here are tiny; 32 MiB fits the scoped default on v5e/v6e/v7x
            # (v7x has only 64 MiB physical VMEM per TensorCore -- keep headroom).
            vmem_limit_bytes=32 * 1024 * 1024),
    )(xlen_p, vcb, hencT, gs2d, Wh.astype(f32), jnp.transpose(Wg).astype(f32))
    return out.reshape(B_pad, T_pad, X_pad)[:B, :T, :X]


# ----------------------------- full forward (gold sequence provided) -----------------------------
def forward(params, x_emb, x_len, gt_index_seq):
    # encoder
    h_enc, (h_n, c_n) = run_enc_lstm(x_emb, x_len, params['enc'])
    # decoder_hidden = tuple(cat((hid[:2], hid[2:]), dim=2))  (assumes N_DEPTH == 2)
    h_dec0 = jnp.concatenate([h_n[:2], h_n[2:]], axis=2)     # (2, B, N_H)
    c_dec0 = jnp.concatenate([c_n[:2], c_n[2:]], axis=2)
    # gold-token one-hot decoder input
    gt_onehot, gt_len = gen_gt_batch(gt_index_seq)
    g_s = run_dec_lstm(gt_onehot, gt_len, params['dec'], h_dec0, c_dec0)
    # pointer scores (Pallas hot path)
    return pointer_scores(h_enc, g_s, x_len,
                          params['Wh'], params['bh'],
                          params['Wg'], params['bg'],
                          params['v'], params['c'])


def _reference_scores(h_enc, g_s, x_len, Wh, bh, Wg, bg, v, c):
    hh = h_enc @ Wh.T + bh
    gg = g_s @ Wg.T + bg
    s = jnp.tanh(hh[:, None, :, :] + gg[:, :, None, :])
    sc = jnp.einsum('btxh,h->btx', s, v.reshape(-1)) + c[0]
    mask = jnp.arange(h_enc.shape[1])[None, None, :] < x_len[:, None, None]
    return jnp.where(mask, sc, -100.0)


# ----------------------------- main -----------------------------
if __name__ == "__main__":
    params = init_params()

    B = 2
    MAX_X_LEN = 16
    x_len = jnp.array([16, 12], dtype=jnp.int32)
    x_emb = jax.random.normal(_next_key(), (B, MAX_X_LEN, N_WORD), dtype=jnp.float32)
    # gold index sequences (start token 0 ... end token 1), variable length
    gt_index_seq = [[0, 5, 7, 9, 11, 13, 15, 17, 1],
                    [0, 4, 6, 8, 10, 12, 1]]

    seq_score = forward(params, x_emb, x_len, gt_index_seq)
    seq_score = jax.block_until_ready(seq_score)

    # cross-check the Pallas hot path against a pure-JAX reference
    h_enc, (h_n, c_n) = run_enc_lstm(x_emb, x_len, params['enc'])
    h_dec0 = jnp.concatenate([h_n[:2], h_n[2:]], axis=2)
    c_dec0 = jnp.concatenate([c_n[:2], c_n[2:]], axis=2)
    gt_onehot, gt_len = gen_gt_batch(gt_index_seq)
    g_s = run_dec_lstm(gt_onehot, gt_len, params['dec'], h_dec0, c_dec0)
    ref = _reference_scores(h_enc, g_s, x_len,
                            params['Wh'], params['bh'],
                            params['Wg'], params['bg'],
                            params['v'], params['c'])

    assert seq_score.shape == (B, gt_onehot.shape[1], MAX_X_LEN)
    # bf16 tanh on v6e/v7x trades a little precision on the (pre-softmax) logits.
    atol = 5e-2 if _use_bf16_tanh(_tpu_kind()) else 1e-4
    assert np.allclose(np.asarray(seq_score), np.asarray(ref), atol=atol), "mismatch vs reference"
    # TODO(synk): the no-gold greedy decoding loop (argmax feedback, data-dependent stop) is
    # host-driven control flow in the original module and is not implemented as a kernel.
    print("KERNEL_OK")
</pallas_src>

<mosaic_0001>
module attributes {stable_mosaic.version = 11 : i64} {
  func.func @_score_kernel(%arg0: i32, %arg1: memref<2xi32, #tpu.memory_space<smem>>, %arg2: memref<65xf32, #tpu.memory_space<smem>>, %arg3: memref<64x128xf32, #tpu.memory_space<vmem>>, %arg4: memref<16x32xf32, #tpu.memory_space<vmem>>, %arg5: memref<32x32xf32, #tpu.memory_space<vmem>>, %arg6: memref<32x32xf32, #tpu.memory_space<vmem>>, %arg7: memref<16x128xf32, #tpu.memory_space<vmem>>, %arg8: memref<16x32xf32, #tpu.memory_space<vmem>>) attributes {dimension_semantics = [#tpu.dimension_semantics<parallel>], iteration_bounds = array<i64: 1>, scalar_prefetch = 2 : i64, scratch_operands = 1 : i64, tpu.core_type = #tpu.core_type<tc>, window_params = [{transform_indices = @transform_0, window_bounds = array<i64: 64, 128>}, {transform_indices = @transform_1, window_bounds = array<i64: 16, 32>}, {pipeline_mode = #tpu.pipeline_mode<synchronous>, transform_indices = @transform_2, window_bounds = array<i64: 32, 32>}, {pipeline_mode = #tpu.pipeline_mode<synchronous>, transform_indices = @transform_3, window_bounds = array<i64: 32, 32>}, {transform_indices = @transform_4, window_bounds = array<i64: 16, 128>}]} {
    %c0 = arith.constant 0 : index
    %c0_0 = arith.constant 0 : index
    %0 = vector.load %arg4[%c0, %c0_0] : memref<16x32xf32, #tpu.memory_space<vmem>>, vector<16x32xf32>
    %c0_1 = arith.constant 0 : index
    %c0_2 = arith.constant 0 : index
    %1 = vector.load %arg6[%c0_1, %c0_2] : memref<32x32xf32, #tpu.memory_space<vmem>>, vector<32x32xf32>
    %cst = arith.constant dense<0.000000e+00> : vector<16x32xf32>
    %2 = tpu.matmul %0, %1, %cst {dimension_numbers = #tpu.dot_dimension_numbers<[1], [0], [0], [1], [0, 0, 1, 1], [], []>} : vector<16x32xf32>, vector<32x32xf32>, vector<16x32xf32> -> vector<16x32xf32>
    %c0_3 = arith.constant 0 : index
    %c0_4 = arith.constant 0 : index
    %3 = vector.load %arg8[%c0_3, %c0_4] : memref<16x32xf32, #tpu.memory_space<vmem>>, vector<16x32xf32>
    tpu.vector_store %arg8[%c0_3, %c0_4], %2 {strides = array<i32>} : memref<16x32xf32, #tpu.memory_space<vmem>>, vector<16x32xf32>,
    %c64 = arith.constant 64 : index
    %4 = memref.load %arg2[%c64] : memref<65xf32, #tpu.memory_space<smem>>
    %5 = tpu.iota {dimensions = array<i32: 1>} : vector<8x128xi32>
    %6 = vector.broadcast %4 : f32 to vector<8x128xf32>
    %cst_5 = arith.constant -1.000000e+02 : f32
    %c0_i32 = arith.constant 0 : i32
    %c2_i32 = arith.constant 2 : i32
    %7 = arith.addi %c0_i32, %c2_i32 : i32
    %c1_i32 = arith.constant 1 : i32
    scf.for %arg9 = %c0_i32 to %7 step %c1_i32  : i32 {
      %c2_i32_7 = arith.constant 2 : i32
      %8 = arith.muli %arg0, %c2_i32_7 : i32
      %9 = arith.addi %8, %arg9 : i32
      %10 = arith.index_cast %9 : i32 to index
      %11 = memref.load %arg1[%10] : memref<2xi32, #tpu.memory_space<smem>>
      %12 = vector.broadcast %11 : i32 to vector<8x128xi32>
      %13 = arith.cmpi slt, %5, %12 : vector<8x128xi32>
      %c32_i32 = arith.constant 32 : i32
      %14 = arith.muli %arg9, %c32_i32 : i32
      %15 = tpu.assume_multiple %14, 32 : i32
      %16 = arith.index_cast %15 : i32 to index
      %c0_8 = arith.constant 0 : index
      %17 = vector.load %arg3[%16, %c0_8] : memref<64x128xf32, #tpu.memory_space<vmem>>, vector<32x128xf32>
      %c0_9 = arith.constant 0 : index
      %c0_10 = arith.constant 0 : index
      %18 = vector.load %arg5[%c0_9, %c0_10] : memref<32x32xf32, #tpu.memory_space<vmem>>, vector<32x32xf32>
      %cst_11 = arith.constant dense<0.000000e+00> : vector<32x128xf32>
      %19 = tpu.matmul %18, %17, %cst_11 {dimension_numbers = #tpu.dot_dimension_numbers<[1], [0], [0], [1], [0, 0, 1, 1], [], []>} : vector<32x32xf32>, vector<32x128xf32>, vector<32x128xf32> -> vector<32x128xf32>
      %c0_i32_12 = arith.constant 0 : i32
      %c8_i32 = arith.constant 8 : i32
      %20 = arith.muli %arg9, %c8_i32 : i32
      %c8_i32_13 = arith.constant 8 : i32
      %21 = arith.muli %c0_i32_12, %c8_i32_13 : i32
      %22 = arith.addi %20, %21 : i32
      %23 = tpu.assume_multiple %22, 8 : i32
      %24 = arith.index_cast %23 : i32 to index
      %c0_14 = arith.constant 0 : index
      %25 = vector.load %arg8[%24, %c0_14] : memref<16x32xf32, #tpu.memory_space<vmem>>, vector<8x32xf32>
      %26 = vector.extract_strided_slice %19 {offsets = [0, 0], sizes = [1, 128], strides = [1, 1]} : vector<32x128xf32> to vector<1x128xf32>
      %c32 = arith.constant 32 : index
      %27 = memref.load %arg2[%c32] : memref<65xf32, #tpu.memory_space<smem>>
      %28 = vector.broadcast %27 : f32 to vector<1x128xf32>
      %29 = arith.addf %26, %28 : vector<1x128xf32>
      %30 = vector.extract_strided_slice %25 {offsets = [0, 0], sizes = [8, 1], strides = [1, 1]} : vector<8x32xf32> to vector<8x1xf32>
      %31 = vector.broadcast %30 : vector<8x1xf32> to vector<8x128xf32>
      %32 = vector.broadcast %29 : vector<1x128xf32> to vector<8x128xf32>
      %33 = arith.addf %31, %32 : vector<8x128xf32>
      %c0_15 = arith.constant 0 : index
      %34 = memref.load %arg2[%c0_15] : memref<65xf32, #tpu.memory_space<smem>>
      %35 = math.tanh %33 : vector<8x128xf32>
      %36 = vector.broadcast %34 : f32 to vector<8x128xf32>
      %37 = arith.mulf %36, %35 : vector<8x128xf32>
      %38 = arith.addf %6, %37 : vector<8x128xf32>
      %39 = vector.extract_strided_slice %19 {offsets = [1, 0], sizes = [1, 128], strides = [1, 1]} : vector<32x128xf32> to vector<1x128xf32>
      %c33 = arith.constant 33 : index
      %40 = memref.load %arg2[%c33] : memref<65xf32, #tpu.memory_space<smem>>
      %41 = vector.broadcast %40 : f32 to vector<1x128xf32>
      %42 = arith.addf %39, %41 : vector<1x128xf32>
      %43 = vector.extract_strided_slice %25 {offsets = [0, 1], sizes = [8, 1], strides = [1, 1]} : vector<8x32xf32> to vector<8x1xf32>
      %44 = vector.broadcast %43 : vector<8x1xf32> to vector<8x128xf32>
      %45 = vector.broadcast %42 : vector<1x128xf32> to vector<8x128xf32>
      %46 = arith.addf %44, %45 : vector<8x128xf32>
      %c1 = arith.constant 1 : index
      %47 = memref.load %arg2[%c1] : memref<65xf32, #tpu.memory_space<smem>>
      %48 = math.tanh %46 : vector<8x128xf32>
      %49 = vector.broadcast %47 : f32 to vector<8x128xf32>
      %50 = arith.mulf %49, %48 : vector<8x128xf32>
      %51 = arith.addf %38, %50 : vector<8x128xf32>
      %52 = vector.extract_strided_slice %19 {offsets = [2, 0], sizes = [1, 128], strides = [1, 1]} : vector<32x128xf32> to vector<1x128xf32>
      %c34 = arith.constant 34 : index
      %53 = memref.load %arg2[%c34] : memref<65xf32, #tpu.memory_space<smem>>
      %54 = vector.broadcast %53 : f32 to vector<1x128xf32>
      %55 = arith.addf %52, %54 : vector<1x128xf32>
      %56 = vector.extract_strided_slice %25 {offsets = [0, 2], sizes = [8, 1], strides = [1, 1]} : vector<8x32xf32> to vector<8x1xf32>
      %57 = vector.broadcast %56 : vector<8x1xf32> to vector<8x128xf32>
      %58 = vector.broadcast %55 : vector<1x128xf32> to vector<8x128xf32>
      %59 = arith.addf %57, %58 : vector<8x128xf32>
      %c2 = arith.constant 2 : index
      %60 = memref.load %arg2[%c2] : memref<65xf32, #tpu.memory_space<smem>>
      %61 = math.tanh %59 : vector<8x128xf32>
      %62 = vector.broadcast %60 : f32 to vector<8x128xf32>
      %63 = arith.mulf %62, %61 : vector<8x128xf32>
      %64 = arith.addf %51, %63 : vector<8x128xf32>
      %65 = vector.extract_strided_slice %19 {offsets = [3, 0], sizes = [1, 128], strides = [1, 1]} : vector<32x128xf32> to vector<1x128xf32>
      %c35 = arith.constant 35 : index
      %66 = memref.load %arg2[%c35] : memref<65xf32, #tpu.memory_space<smem>>
      %67 = vector.broadcast %66 : f32 to vector<1x128xf32>
      %68 = arith.addf %65, %67 : vector<1x128xf32>
      %69 = vector.extract_strided_slice %25 {offsets = [0, 3], sizes = [8, 1], strides = [1, 1]} : vector<8x32xf32> to vector<8x1xf32>
      %70 = vector.broadcast %69 : vector<8x1xf32> to vector<8x128xf32>
      %71 = vector.broadcast %68 : vector<1x128xf32> to vector<8x128xf32>
      %72 = arith.addf %70, %71 : vector<8x128xf32>
      %c3 = arith.constant 3 : index
      %73 = memref.load %arg2[%c3] : memref<65xf32, #tpu.memory_space<smem>>
      %74 = math.tanh %72 : vector<8x128xf32>
      %75 = vector.broadcast %73 : f32 to vector<8x128xf32>
      %76 = arith.mulf %75, %74 : vector<8x128xf32>
      %77 = arith.addf %64, %76 : vector<8x128xf32>
      %78 = vector.extract_strided_slice %19 {offsets = [4, 0], sizes = [1, 128], strides = [1, 1]} : vector<32x128xf32> to vector<1x128xf32>
      %c36 = arith.constant 36 : index
      %79 = memref.load %arg2[%c36] : memref<65xf32, #tpu.memory_space<smem>>
      %80 = vector.broadcast %79 : f32 to vector<1x128xf32>
      %81 = arith.addf %78, %80 : vector<1x128xf32>
      %82 = vector.extract_strided_slice %25 {offsets = [0, 4], sizes = [8, 1], strides = [1, 1]} : vector<8x32xf32> to vector<8x1xf32>
      %83 = vector.broadcast %82 : vector<8x1xf32> to vector<8x128xf32>
      %84 = vector.broadcast %81 : vector<1x128xf32> to vector<8x128xf32>
      %85 = arith.addf %83, %84 : vector<8x128xf32>
      %c4 = arith.constant 4 : index
      %86 = memref.load %arg2[%c4] : memref<65xf32, #tpu.memory_space<smem>>
      %87 = math.tanh %85 : vector<8x128xf32>
      %88 = vector.broadcast %86 : f32 to vector<8x128xf32>
      %89 = arith.mulf %88, %87 : vector<8x128xf32>
      %90 = arith.addf %77, %89 : vector<8x128xf32>
      %91 = vector.extract_strided_slice %19 {offsets = [5, 0], sizes = [1, 128], strides = [1, 1]} : vector<32x128xf32> to vector<1x128xf32>
      %c37 = arith.constant 37 : index
      %92 = memref.load %arg2[%c37] : memref<65xf32, #tpu.memory_space<smem>>
      %93 = vector.broadcast %92 : f32 to vector<1x128xf32>
      %94 = arith.addf %91, %93 : vector<1x128xf32>
      %95 = vector.extract_strided_slice %25 {offsets = [0, 5], sizes = [8, 1], strides = [1, 1]} : vector<8x32xf32> to vector<8x1xf32>
      %96 = vector.broadcast %95 : vector<8x1xf32> to vector<8x128xf32>
      %97 = vector.broadcast %94 : vector<1x128xf32> to vector<8x128xf32>
      %98 = arith.addf %96, %97 : vector<8x128xf32>
      %c5 = arith.constant 5 : index
      %99 = memref.load %arg2[%c5] : memref<65xf32, #tpu.memory_space<smem>>
      %100 = math.tanh %98 : vector<8x128xf32>
      %101 = vector.broadcast %99 : f32 to vector<8x128xf32>
      %102 = arith.mulf %101, %100 : vector<8x128xf32>
      %103 = arith.addf %90, %102 : vector<8x128xf32>
      %104 = vector.extract_strided_slice %19 {offsets = [6, 0], sizes = [1, 128], strides = [1, 1]} : vector<32x128xf32> to vector<1x128xf32>
      %c38 = arith.constant 38 : index
      %105 = memref.load %arg2[%c38] : memref<65xf32, #tpu.memory_space<smem>>
      %106 = vector.broadcast %105 : f32 to vector<1x128xf32>
      %107 = arith.addf %104, %106 : vector<1x128xf32>
      %108 = vector.extract_strided_slice %25 {offsets = [0, 6], sizes = [8, 1], strides = [1, 1]} : vector<8x32xf32> to vector<8x1xf32>
      %109 = vector.broadcast %108 : vector<8x1xf32> to vector<8x128xf32>
      %110 = vector.broadcast %107 : vector<1x128xf32> to vector<8x128xf32>
      %111 = arith.addf %109, %110 : vector<8x128xf32>
      %c6 = arith.constant 6 : index
      %112 = memref.load %arg2[%c6] : memref<65xf32, #tpu.memory_space<smem>>
      %113 = math.tanh %111 : vector<8x128xf32>
      %114 = vector.broadcast %112 : f32 to vector<8x128xf32>
      %115 = arith.mulf %114, %113 : vector<8x128xf32>
      %116 = arith.addf %103, %115 : vector<8x128xf32>
      %117 = vector.extract_strided_slice %19 {offsets = [7, 0], sizes = [1, 128], strides = [1, 1]} : vector<32x128xf32> to vector<1x128xf32>
      %c39 = arith.constant 39 : index
      %118 = memref.load %arg2[%c39] : memref<65xf32, #tpu.memory_space<smem>>
      %119 = vector.broadcast %118 : f32 to vector<1x128xf32>
      %120 = arith.addf %117, %119 : vector<1x128xf32>
      %121 = vector.extract_strided_slice %25 {offsets = [0, 7], sizes = [8, 1], strides = [1, 1]} : vector<8x32xf32> to vector<8x1xf32>
      %122 = vector.broadcast %121 : vector<8x1xf32> to vector<8x128xf32>
      %123 = vector.broadcast %120 : vector<1x128xf32> to vector<8x128xf32>
      %124 = arith.addf %122, %123 : vector<8x128xf32>
      %c7 = arith.constant 7 : index
      %125 = memref.load %arg2[%c7] : memref<65xf32, #tpu.memory_space<smem>>
      %126 = math.tanh %124 : vector<8x128xf32>
      %127 = vector.broadcast %125 : f32 to vector<8x128xf32>
      %128 = arith.mulf %127, %126 : vector<8x128xf32>
      %129 = arith.addf %116, %128 : vector<8x128xf32>
      %130 = vector.extract_strided_slice %19 {offsets = [8, 0], sizes = [1, 128], strides = [1, 1]} : vector<32x128xf32> to vector<1x128xf32>
      %c40 = arith.constant 40 : index
      %131 = memref.load %arg2[%c40] : memref<65xf32, #tpu.memory_space<smem>>
      %132 = vector.broadcast %131 : f32 to vector<1x128xf32>
      %133 = arith.addf %130, %132 : vector<1x128xf32>
      %134 = vector.extract_strided_slice %25 {offsets = [0, 8], sizes = [8, 1], strides = [1, 1]} : vector<8x32xf32> to vector<8x1xf32>
      %135 = vector.broadcast %134 : vector<8x1xf32> to vector<8x128xf32>
      %136 = vector.broadcast %133 : vector<1x128xf32> to vector<8x128xf32>
      %137 = arith.addf %135, %136 : vector<8x128xf32>
      %c8 = arith.constant 8 : index
      %138 = memref.load %arg2[%c8] : memref<65xf32, #tpu.memory_space<smem>>
      %139 = math.tanh %137 : vector<8x128xf32>
      %140 = vector.broadcast %138 : f32 to vector<8x128xf32>
      %141 = arith.mulf %140, %139 : vector<8x128xf32>
      %142 = arith.addf %129, %141 : vector<8x128xf32>
      %143 = vector.extract_strided_slice %19 {offsets = [9, 0], sizes = [1, 128], strides = [1, 1]} : vector<32x128xf32> to vector<1x128xf32>
      %c41 = arith.constant 41 : index
      %144 = memref.load %arg2[%c41] : memref<65xf32, #tpu.memory_space<smem>>
      %145 = vector.broadcast %144 : f32 to vector<1x128xf32>
      %146 = arith.addf %143, %145 : vector<1x128xf32>
      %147 = vector.extract_strided_slice %25 {offsets = [0, 9], sizes = [8, 1], strides = [1, 1]} : vector<8x32xf32> to vector<8x1xf32>
      %148 = vector.broadcast %147 : vector<8x1xf32> to vector<8x128xf32>
      %149 = vector.broadcast %146 : vector<1x128xf32> to vector<8x128xf32>
      %150 = arith.addf %148, %149 : vector<8x128xf32>
      %c9 = arith.constant 9 : index
      %151 = memref.load %arg2[%c9] : memref<65xf32, #tpu.memory_space<smem>>
      %152 = math.tanh %150 : vector<8x128xf32>
      %153 = vector.broadcast %151 : f32 to vector<8x128xf32>
      %154 = arith.mulf %153, %152 : vector<8x128xf32>
      %155 = arith.addf %142, %154 : vector<8x128xf32>
      %156 = vector.extract_strided_slice %19 {offsets = [10, 0], sizes = [1, 128], strides = [1, 1]} : vector<32x128xf32> to vector<1x128xf32>
      %c42 = arith.constant 42 : index
      %157 = memref.load %arg2[%c42] : memref<65xf32, #tpu.memory_space<smem>>
      %158 = vector.broadcast %157 : f32 to vector<1x128xf32>
      %159 = arith.addf %156, %158 : vector<1x128xf32>
      %160 = vector.extract_strided_slice %25 {offsets = [0, 10], sizes = [8, 1], strides = [1, 1]} : vector<8x32xf32> to vector<8x1xf32>
      %161 = vector.broadcast %160 : vector<8x1xf32> to vector<8x128xf32>
      %162 = vector.broadcast %159 : vector<1x128xf32> to vector<8x128xf32>
      %163 = arith.addf %161, %162 : vector<8x128xf32>
      %c10 = arith.constant 10 : index
      %164 = memref.load %arg2[%c10] : memref<65xf32, #tpu.memory_space<smem>>
      %165 = math.tanh %163 : vector<8x128xf32>
      %166 = vector.broadcast %164 : f32 to vector<8x128xf32>
      %167 = arith.mulf %166, %165 : vector<8x128xf32>
      %168 = arith.addf %155, %167 : vector<8x128xf32>
      %169 = vector.extract_strided_slice %19 {offsets = [11, 0], sizes = [1, 128], strides = [1, 1]} : vector<32x128xf32> to vector<1x128xf32>
      %c43 = arith.constant 43 : index
      %170 = memref.load %arg2[%c43] : memref<65xf32, #tpu.memory_space<smem>>
      %171 = vector.broadcast %170 : f32 to vector<1x128xf32>
      %172 = arith.addf %169, %171 : vector<1x128xf32>
      %173 = vector.extract_strided_slice %25 {offsets = [0, 11], sizes = [8, 1], strides = [1, 1]} : vector<8x32xf32> to vector<8x1xf32>
      %174 = vector.broadcast %173 : vector<8x1xf32> to vector<8x128xf32>
      %175 = vector.broadcast %172 : vector<1x128xf32> to vector<8x128xf32>
      %176 = arith.addf %174, %175 : vector<8x128xf32>
      %c11 = arith.constant 11 : index
      %177 = memref.load %arg2[%c11] : memref<65xf32, #tpu.memory_space<smem>>
      %178 = math.tanh %176 : vector<8x128xf32>
      %179 = vector.broadcast %177 : f32 to vector<8x128xf32>
      %180 = arith.mulf %179, %178 : vector<8x128xf32>
      %181 = arith.addf %168, %180 : vector<8x128xf32>
      %182 = vector.extract_strided_slice %19 {offsets = [12, 0], sizes = [1, 128], strides = [1, 1]} : vector<32x128xf32> to vector<1x128xf32>
      %c44 = arith.constant 44 : index
      %183 = memref.load %arg2[%c44] : memref<65xf32, #tpu.memory_space<smem>>
      %184 = vector.broadcast %183 : f32 to vector<1x128xf32>
      %185 = arith.addf %182, %184 : vector<1x128xf32>
      %186 = vector.extract_strided_slice %25 {offsets = [0, 12], sizes = [8, 1], strides = [1, 1]} : vector<8x32xf32> to vector<8x1xf32>
      %187 = vector.broadcast %186 : vector<8x1xf32> to vector<8x128xf32>
      %188 = vector.broadcast %185 : vector<1x128xf32> to vector<8x128xf32>
      %189 = arith.addf %187, %188 : vector<8x128xf32>
      %c12 = arith.constant 12 : index
      %190 = memref.load %arg2[%c12] : memref<65xf32, #tpu.memory_space<smem>>
      %191 = math.tanh %189 : vector<8x128xf32>
      %192 = vector.broadcast %190 : f32 to vector<8x128xf32>
      %193 = arith.mulf %192, %191 : vector<8x128xf32>
      %194 = arith.addf %181, %193 : vector<8x128xf32>
      %195 = vector.extract_strided_slice %19 {offsets = [13, 0], sizes = [1, 128], strides = [1, 1]} : vector<32x128xf32> to vector<1x128xf32>
      %c45 = arith.constant 45 : index
      %196 = memref.load %arg2[%c45] : memref<65xf32, #tpu.memory_space<smem>>
      %197 = vector.broadcast %196 : f32 to vector<1x128xf32>
      %198 = arith.addf %195, %197 : vector<1x128xf32>
      %199 = vector.extract_strided_slice %25 {offsets = [0, 13], sizes = [8, 1], strides = [1, 1]} : vector<8x32xf32> to vector<8x1xf32>
      %200 = vector.broadcast %199 : vector<8x1xf32> to vector<8x128xf32>
      %201 = vector.broadcast %198 : vector<1x128xf32> to vector<8x128xf32>
      %202 = arith.addf %200, %201 : vector<8x128xf32>
      %c13 = arith.constant 13 : index
      %203 = memref.load %arg2[%c13] : memref<65xf32, #tpu.memory_space<smem>>
      %204 = math.tanh %202 : vector<8x128xf32>
      %205 = vector.broadcast %203 : f32 to vector<8x128xf32>
      %206 = arith.mulf %205, %204 : vector<8x128xf32>
      %207 = arith.addf %194, %206 : vector<8x128xf32>
      %208 = vector.extract_strided_slice %19 {offsets = [14, 0], sizes = [1, 128], strides = [1, 1]} : vector<32x128xf32> to vector<1x128xf32>
      %c46 = arith.constant 46 : index
      %209 = memref.load %arg2[%c46] : memref<65xf32, #tpu.memory_space<smem>>
      %210 = vector.broadcast %209 : f32 to vector<1x128xf32>
      %211 = arith.addf %208, %210 : vector<1x128xf32>
      %212 = vector.extract_strided_slice %25 {offsets = [0, 14], sizes = [8, 1], strides = [1, 1]} : vector<8x32xf32> to vector<8x1xf32>
      %213 = vector.broadcast %212 : vector<8x1xf32> to vector<8x128xf32>
      %214 = vector.broadcast %211 : vector<1x128xf32> to vector<8x128xf32>
      %215 = arith.addf %213, %214 : vector<8x128xf32>
      %c14 = arith.constant 14 : index
      %216 = memref.load %arg2[%c14] : memref<65xf32, #tpu.memory_space<smem>>
      %217 = math.tanh %215 : vector<8x128xf32>
      %218 = vector.broadcast %216 : f32 to vector<8x128xf32>
      %219 = arith.mulf %218, %217 : vector<8x128xf32>
      %220 = arith.addf %207, %219 : vector<8x128xf32>
      %221 = vector.extract_strided_slice %19 {offsets = [15, 0], sizes = [1, 128], strides = [1, 1]} : vector<32x128xf32> to vector<1x128xf32>
      %c47 = arith.constant 47 : index
      %222 = memref.load %arg2[%c47] : memref<65xf32, #tpu.memory_space<smem>>
      %223 = vector.broadcast %222 : f32 to vector<1x128xf32>
      %224 = arith.addf %221, %223 : vector<1x128xf32>
      %225 = vector.extract_strided_slice %25 {offsets = [0, 15], sizes = [8, 1], strides = [1, 1]} : vector<8x32xf32> to vector<8x1xf32>
      %226 = vector.broadcast %225 : vector<8x1xf32> to vector<8x128xf32>
      %227 = vector.broadcast %224 : vector<1x128xf32> to vector<8x128xf32>
      %228 = arith.addf %226, %227 : vector<8x128xf32>
      %c15 = arith.constant 15 : index
      %229 = memref.load %arg2[%c15] : memref<65xf32, #tpu.memory_space<smem>>
      %230 = math.tanh %228 : vector<8x128xf32>
      %231 = vector.broadcast %229 : f32 to vector<8x128xf32>
      %232 = arith.mulf %231, %230 : vector<8x128xf32>
      %233 = arith.addf %220, %232 : vector<8x128xf32>
      %234 = vector.extract_strided_slice %19 {offsets = [16, 0], sizes = [1, 128], strides = [1, 1]} : vector<32x128xf32> to vector<1x128xf32>
      %c48 = arith.constant 48 : index
      %235 = memref.load %arg2[%c48] : memref<65xf32, #tpu.memory_space<smem>>
      %236 = vector.broadcast %235 : f32 to vector<1x128xf32>
      %237 = arith.addf %234, %236 : vector<1x128xf32>
      %238 = vector.extract_strided_slice %25 {offsets = [0, 16], sizes = [8, 1], strides = [1, 1]} : vector<8x32xf32> to vector<8x1xf32>
      %239 = vector.broadcast %238 : vector<8x1xf32> to vector<8x128xf32>
      %240 = vector.broadcast %237 : vector<1x128xf32> to vector<8x128xf32>
      %241 = arith.addf %239, %240 : vector<8x128xf32>
      %c16 = arith.constant 16 : index
      %242 = memref.load %arg2[%c16] : memref<65xf32, #tpu.memory_space<smem>>
      %243 = math.tanh %241 : vector<8x128xf32>
      %244 = vector.broadcast %242 : f32 to vector<8x128xf32>
      %245 = arith.mulf %244, %243 : vector<8x128xf32>
      %246 = arith.addf %233, %245 : vector<8x128xf32>
      %247 = vector.extract_strided_slice %19 {offsets = [17, 0], sizes = [1, 128], strides = [1, 1]} : vector<32x128xf32> to vector<1x128xf32>
      %c49 = arith.constant 49 : index
      %248 = memref.load %arg2[%c49] : memref<65xf32, #tpu.memory_space<smem>>
      %249 = vector.broadcast %248 : f32 to vector<1x128xf32>
      %250 = arith.addf %247, %249 : vector<1x128xf32>
      %251 = vector.extract_strided_slice %25 {offsets = [0, 17], sizes = [8, 1], strides = [1, 1]} : vector<8x32xf32> to vector<8x1xf32>
      %252 = vector.broadcast %251 : vector<8x1xf32> to vector<8x128xf32>
      %253 = vector.broadcast %250 : vector<1x128xf32> to vector<8x128xf32>
      %254 = arith.addf %252, %253 : vector<8x128xf32>
      %c17 = arith.constant 17 : index
      %255 = memref.load %arg2[%c17] : memref<65xf32, #tpu.memory_space<smem>>
      %256 = math.tanh %254 : vector<8x128xf32>
      %257 = vector.broadcast %255 : f32 to vector<8x128xf32>
      %258 = arith.mulf %257, %256 : vector<8x128xf32>
      %259 = arith.addf %246, %258 : vector<8x128xf32>
      %260 = vector.extract_strided_slice %19 {offsets = [18, 0], sizes = [1, 128], strides = [1, 1]} : vector<32x128xf32> to vector<1x128xf32>
      %c50 = arith.constant 50 : index
      %261 = memref.load %arg2[%c50] : memref<65xf32, #tpu.memory_space<smem>>
      %262 = vector.broadcast %261 : f32 to vector<1x128xf32>
      %263 = arith.addf %260, %262 : vector<1x128xf32>
      %264 = vector.extract_strided_slice %25 {offsets = [0, 18], sizes = [8, 1], strides = [1, 1]} : vector<8x32xf32> to vector<8x1xf32>
      %265 = vector.broadcast %264 : vector<8x1xf32> to vector<8x128xf32>
      %266 = vector.broadcast %263 : vector<1x128xf32> to vector<8x128xf32>
      %267 = arith.addf %265, %266 : vector<8x128xf32>
      %c18 = arith.constant 18 : index
      %268 = memref.load %arg2[%c18] : memref<65xf32, #tpu.memory_space<smem>>
      %269 = math.tanh %267 : vector<8x128xf32>
      %270 = vector.broadcast %268 : f32 to vector<8x128xf32>
      %271 = arith.mulf %270, %269 : vector<8x128xf32>
      %272 = arith.addf %259, %271 : vector<8x128xf32>
      %273 = vector.extract_strided_slice %19 {offsets = [19, 0], sizes = [1, 128], strides = [1, 1]} : vector<32x128xf32> to vector<1x128xf32>
      %c51 = arith.constant 51 : index
      %274 = memref.load %arg2[%c51] : memref<65xf32, #tpu.memory_space<smem>>
      %275 = vector.broadcast %274 : f32 to vector<1x128xf32>
      %276 = arith.addf %273, %275 : vector<1x128xf32>
      %277 = vector.extract_strided_slice %25 {offsets = [0, 19], sizes = [8, 1], strides = [1, 1]} : vector<8x32xf32> to vector<8x1xf32>
      %278 = vector.broadcast %277 : vector<8x1xf32> to vector<8x128xf32>
      %279 = vector.broadcast %276 : vector<1x128xf32> to vector<8x128xf32>
      %280 = arith.addf %278, %279 : vector<8x128xf32>
      %c19 = arith.constant 19 : index
      %281 = memref.load %arg2[%c19] : memref<65xf32, #tpu.memory_space<smem>>
      %282 = math.tanh %280 : vector<8x128xf32>
      %283 = vector.broadcast %281 : f32 to vector<8x128xf32>
      %284 = arith.mulf %283, %282 : vector<8x128xf32>
      %285 = arith.addf %272, %284 : vector<8x128xf32>
      %286 = vector.extract_strided_slice %19 {offsets = [20, 0], sizes = [1, 128], strides = [1, 1]} : vector<32x128xf32> to vector<1x128xf32>
      %c52 = arith.constant 52 : index
      %287 = memref.load %arg2[%c52] : memref<65xf32, #tpu.memory_space<smem>>
      %288 = vector.broadcast %287 : f32 to vector<1x128xf32>
      %289 = arith.addf %286, %288 : vector<1x128xf32>
      %290 = vector.extract_strided_slice %25 {offsets = [0, 20], sizes = [8, 1], strides = [1, 1]} : vector<8x32xf32> to vector<8x1xf32>
      %291 = vector.broadcast %290 : vector<8x1xf32> to vector<8x128xf32>
      %292 = vector.broadcast %289 : vector<1x128xf32> to vector<8x128xf32>
      %293 = arith.addf %291, %292 : vector<8x128xf32>
      %c20 = arith.constant 20 : index
      %294 = memref.load %arg2[%c20] : memref<65xf32, #tpu.memory_space<smem>>
      %295 = math.tanh %293 : vector<8x128xf32>
      %296 = vector.broadcast %294 : f32 to vector<8x128xf32>
      %297 = arith.mulf %296, %295 : vector<8x128xf32>
      %298 = arith.addf %285, %297 : vector<8x128xf32>
      %299 = vector.extract_strided_slice %19 {offsets = [21, 0], sizes = [1, 128], strides = [1, 1]} : vector<32x128xf32> to vector<1x128xf32>
      %c53 = arith.constant 53 : index
      %300 = memref.load %arg2[%c53] : memref<65xf32, #tpu.memory_space<smem>>
      %301 = vector.broadcast %300 : f32 to vector<1x128xf32>
      %302 = arith.addf %299, %301 : vector<1x128xf32>
      %303 = vector.extract_strided_slice %25 {offsets = [0, 21], sizes = [8, 1], strides = [1, 1]} : vector<8x32xf32> to vector<8x1xf32>
      %304 = vector.broadcast %303 : vector<8x1xf32> to vector<8x128xf32>
      %305 = vector.broadcast %302 : vector<1x128xf32> to vector<8x128xf32>
      %306 = arith.addf %304, %305 : vector<8x128xf32>
      %c21 = arith.constant 21 : index
      %307 = memref.load %arg2[%c21] : memref<65xf32, #tpu.memory_space<smem>>
      %308 = math.tanh %306 : vector<8x128xf32>
      %309 = vector.broadcast %307 : f32 to vector<8x128xf32>
      %310 = arith.mulf %309, %308 : vector<8x128xf32>
      %311 = arith.addf %298, %310 : vector<8x128xf32>
      %312 = vector.extract_strided_slice %19 {offsets = [22, 0], sizes = [1, 128], strides = [1, 1]} : vector<32x128xf32> to vector<1x128xf32>
      %c54 = arith.constant 54 : index
      %313 = memref.load %arg2[%c54] : memref<65xf32, #tpu.memory_space<smem>>
      %314 = vector.broadcast %313 : f32 to vector<1x128xf32>
      %315 = arith.addf %312, %314 : vector<1x128xf32>
      %316 = vector.extract_strided_slice %25 {offsets = [0, 22], sizes = [8, 1], strides = [1, 1]} : vector<8x32xf32> to vector<8x1xf32>
      %317 = vector.broadcast %316 : vector<8x1xf32> to vector<8x128xf32>
      %318 = vector.broadcast %315 : vector<1x128xf32> to vector<8x128xf32>
      %319 = arith.addf %317, %318 : vector<8x128xf32>
      %c22 = arith.constant 22 : index
      %320 = memref.load %arg2[%c22] : memref<65xf32, #tpu.memory_space<smem>>
      %321 = math.tanh %319 : vector<8x128xf32>
      %322 = vector.broadcast %320 : f32 to vector<8x128xf32>
      %323 = arith.mulf %322, %321 : vector<8x128xf32>
      %324 = arith.addf %311, %323 : vector<8x128xf32>
      %325 = vector.extract_strided_slice %19 {offsets = [23, 0], sizes = [1, 128], strides = [1, 1]} : vector<32x128xf32> to vector<1x128xf32>
      %c55 = arith.constant 55 : index
      %326 = memref.load %arg2[%c55] : memref<65xf32, #tpu.memory_space<smem>>
      %327 = vector.broadcast %326 : f32 to vector<1x128xf32>
      %328 = arith.addf %325, %327 : vector<1x128xf32>
      %329 = vector.extract_strided_slice %25 {offsets = [0, 23], sizes = [8, 1], strides = [1, 1]} : vector<8x32xf32> to vector<8x1xf32>
      %330 = vector.broadcast %329 : vector<8x1xf32> to vector<8x128xf32>
      %331 = vector.broadcast %328 : vector<1x128xf32> to vector<8x128xf32>
      %332 = arith.addf %330, %331 : vector<8x128xf32>
      %c23 = arith.constant 23 : index
      %333 = memref.load %arg2[%c23] : memref<65xf32, #tpu.memory_space<smem>>
      %334 = math.tanh %332 : vector<8x128xf32>
      %335 = vector.broadcast %333 : f32 to vector<8x128xf32>
      %336 = arith.mulf %335, %334 : vector<8x128xf32>
      %337 = arith.addf %324, %336 : vector<8x128xf32>
      %338 = vector.extract_strided_slice %19 {offsets = [24, 0], sizes = [1, 128], strides = [1, 1]} : vector<32x128xf32> to vector<1x128xf32>
      %c56 = arith.constant 56 : index
      %339 = memref.load %arg2[%c56] : memref<65xf32, #tpu.memory_space<smem>>
      %340 = vector.broadcast %339 : f32 to vector<1x128xf32>
      %341 = arith.addf %338, %340 : vector<1x128xf32>
      %342 = vector.extract_strided_slice %25 {offsets = [0, 24], sizes = [8, 1], strides = [1, 1]} : vector<8x32xf32> to vector<8x1xf32>
      %343 = vector.broadcast %342 : vector<8x1xf32> to vector<8x128xf32>
      %344 = vector.broadcast %341 : vector<1x128xf32> to vector<8x128xf32>
      %345 = arith.addf %343, %344 : vector<8x128xf32>
      %c24 = arith.constant 24 : index
      %346 = memref.load %arg2[%c24] : memref<65xf32, #tpu.memory_space<smem>>
      %347 = math.tanh %345 : vector<8x128xf32>
      %348 = vector.broadcast %346 : f32 to vector<8x128xf32>
      %349 = arith.mulf %348, %347 : vector<8x128xf32>
      %350 = arith.addf %337, %349 : vector<8x128xf32>
      %351 = vector.extract_strided_slice %19 {offsets = [25, 0], sizes = [1, 128], strides = [1, 1]} : vector<32x128xf32> to vector<1x128xf32>
      %c57 = arith.constant 57 : index
      %352 = memref.load %arg2[%c57] : memref<65xf32, #tpu.memory_space<smem>>
      %353 = vector.broadcast %352 : f32 to vector<1x128xf32>
      %354 = arith.addf %351, %353 : vector<1x128xf32>
      %355 = vector.extract_strided_slice %25 {offsets = [0, 25], sizes = [8, 1], strides = [1, 1]} : vector<8x32xf32> to vector<8x1xf32>
      %356 = vector.broadcast %355 : vector<8x1xf32> to vector<8x128xf32>
      %357 = vector.broadcast %354 : vector<1x128xf32> to vector<8x128xf32>
      %358 = arith.addf %356, %357 : vector<8x128xf32>
      %c25 = arith.constant 25 : index
      %359 = memref.load %arg2[%c25] : memref<65xf32, #tpu.memory_space<smem>>
      %360 = math.tanh %358 : vector<8x128xf32>
      %361 = vector.broadcast %359 : f32 to vector<8x128xf32>
      %362 = arith.mulf %361, %360 : vector<8x128xf32>
      %363 = arith.addf %350, %362 : vector<8x128xf32>
      %364 = vector.extract_strided_slice %19 {offsets = [26, 0], sizes = [1, 128], strides = [1, 1]} : vector<32x128xf32> to vector<1x128xf32>
      %c58 = arith.constant 58 : index
      %365 = memref.load %arg2[%c58] : memref<65xf32, #tpu.memory_space<smem>>
      %366 = vector.broadcast %365 : f32 to vector<1x128xf32>
      %367 = arith.addf %364, %366 : vector<1x128xf32>
      %368 = vector.extract_strided_slice %25 {offsets = [0, 26], sizes = [8, 1], strides = [1, 1]} : vector<8x32xf32> to vector<8x1xf32>
      %369 = vector.broadcast %368 : vector<8x1xf32> to vector<8x128xf32>
      %370 = vector.broadcast %367 : vector<1x128xf32> to vector<8x128xf32>
      %371 = arith.addf %369, %370 : vector<8x128xf32>
      %c26 = arith.constant 26 : index
      %372 = memref.load %arg2[%c26] : memref<65xf32, #tpu.memory_space<smem>>
      %373 = math.tanh %371 : vector<8x128xf32>
      %374 = vector.broadcast %372 : f32 to vector<8x128xf32>
      %375 = arith.mulf %374, %373 : vector<8x128xf32>
      %376 = arith.addf %363, %375 : vector<8x128xf32>
      %377 = vector.extract_strided_slice %19 {offsets = [27, 0], sizes = [1, 128], strides = [1, 1]} : vector<32x128xf32> to vector<1x128xf32>
      %c59 = arith.constant 59 : index
      %378 = memref.load %arg2[%c59] : memref<65xf32, #tpu.memory_space<smem>>
      %379 = vector.broadcast %378 : f32 to vector<1x128xf32>
      %380 = arith.addf %377, %379 : vector<1x128xf32>
      %381 = vector.extract_strided_slice %25 {offsets = [0, 27], sizes = [8, 1], strides = [1, 1]} : vector<8x32xf32> to vector<8x1xf32>
      %382 = vector.broadcast %381 : vector<8x1xf32> to vector<8x128xf32>
      %383 = vector.broadcast %380 : vector<1x128xf32> to vector<8x128xf32>
      %384 = arith.addf %382, %383 : vector<8x128xf32>
      %c27 = arith.constant 27 : index
      %385 = memref.load %arg2[%c27] : memref<65xf32, #tpu.memory_space<smem>>
      %386 = math.tanh %384 : vector<8x128xf32>
      %387 = vector.broadcast %385 : f32 to vector<8x128xf32>
      %388 = arith.mulf %387, %386 : vector<8x128xf32>
      %389 = arith.addf %376, %388 : vector<8x128xf32>
      %390 = vector.extract_strided_slice %19 {offsets = [28, 0], sizes = [1, 128], strides = [1, 1]} : vector<32x128xf32> to vector<1x128xf32>
      %c60 = arith.constant 60 : index
      %391 = memref.load %arg2[%c60] : memref<65xf32, #tpu.memory_space<smem>>
      %392 = vector.broadcast %391 : f32 to vector<1x128xf32>
      %393 = arith.addf %390, %392 : vector<1x128xf32>
      %394 = vector.extract_strided_slice %25 {offsets = [0, 28], sizes = [8, 1], strides = [1, 1]} : vector<8x32xf32> to vector<8x1xf32>
      %395 = vector.broadcast %394 : vector<8x1xf32> to vector<8x128xf32>
      %396 = vector.broadcast %393 : vector<1x128xf32> to vector<8x128xf32>
      %397 = arith.addf %395, %396 : vector<8x128xf32>
      %c28 = arith.constant 28 : index
      %398 = memref.load %arg2[%c28] : memref<65xf32, #tpu.memory_space<smem>>
      %399 = math.tanh %397 : vector<8x128xf32>
      %400 = vector.broadcast %398 : f32 to vector<8x128xf32>
      %401 = arith.mulf %400, %399 : vector<8x128xf32>
      %402 = arith.addf %389, %401 : vector<8x128xf32>
      %403 = vector.extract_strided_slice %19 {offsets = [29, 0], sizes = [1, 128], strides = [1, 1]} : vector<32x128xf32> to vector<1x128xf32>
      %c61 = arith.constant 61 : index
      %404 = memref.load %arg2[%c61] : memref<65xf32, #tpu.memory_space<smem>>
      %405 = vector.broadcast %404 : f32 to vector<1x128xf32>
      %406 = arith.addf %403, %405 : vector<1x128xf32>
      %407 = vector.extract_strided_slice %25 {offsets = [0, 29], sizes = [8, 1], strides = [1, 1]} : vector<8x32xf32> to vector<8x1xf32>
      %408 = vector.broadcast %407 : vector<8x1xf32> to vector<8x128xf32>
      %409 = vector.broadcast %406 : vector<1x128xf32> to vector<8x128xf32>
      %410 = arith.addf %408, %409 : vector<8x128xf32>
      %c29 = arith.constant 29 : index
      %411 = memref.load %arg2[%c29] : memref<65xf32, #tpu.memory_space<smem>>
      %412 = math.tanh %410 : vector<8x128xf32>
      %413 = vector.broadcast %411 : f32 to vector<8x128xf32>
      %414 = arith.mulf %413, %412 : vector<8x128xf32>
      %415 = arith.addf %402, %414 : vector<8x128xf32>
      %416 = vector.extract_strided_slice %19 {offsets = [30, 0], sizes = [1, 128], strides = [1, 1]} : vector<32x128xf32> to vector<1x128xf32>
      %c62 = arith.constant 62 : index
      %417 = memref.load %arg2[%c62] : memref<65xf32, #tpu.memory_space<smem>>
      %418 = vector.broadcast %417 : f32 to vector<1x128xf32>
      %419 = arith.addf %416, %418 : vector<1x128xf32>
      %420 = vector.extract_strided_slice %25 {offsets = [0, 30], sizes = [8, 1], strides = [1, 1]} : vector<8x32xf32> to vector<8x1xf32>
      %421 = vector.broadcast %420 : vector<8x1xf32> to vector<8x128xf32>
      %422 = vector.broadcast %419 : vector<1x128xf32> to vector<8x128xf32>
      %423 = arith.addf %421, %422 : vector<8x128xf32>
      %c30 = arith.constant 30 : index
      %424 = memref.load %arg2[%c30] : memref<65xf32, #tpu.memory_space<smem>>
      %425 = math.tanh %423 : vector<8x128xf32>
      %426 = vector.broadcast %424 : f32 to vector<8x128xf32>
      %427 = arith.mulf %426, %425 : vector<8x128xf32>
      %428 = arith.addf %415, %427 : vector<8x128xf32>
      %429 = vector.extract_strided_slice %19 {offsets = [31, 0], sizes = [1, 128], strides = [1, 1]} : vector<32x128xf32> to vector<1x128xf32>
      %c63 = arith.constant 63 : index
      %430 = memref.load %arg2[%c63] : memref<65xf32, #tpu.memory_space<smem>>
      %431 = vector.broadcast %430 : f32 to vector<1x128xf32>
      %432 = arith.addf %429, %431 : vector<1x128xf32>
      %433 = vector.extract_strided_slice %25 {offsets = [0, 31], sizes = [8, 1], strides = [1, 1]} : vector<8x32xf32> to vector<8x1xf32>
      %434 = vector.broadcast %433 : vector<8x1xf32> to vector<8x128xf32>
      %435 = vector.broadcast %432 : vector<1x128xf32> to vector<8x128xf32>
      %436 = arith.addf %434, %435 : vector<8x128xf32>
      %c31 = arith.constant 31 : index
      %437 = memref.load %arg2[%c31] : memref<65xf32, #tpu.memory_space<smem>>
      %438 = math.tanh %436 : vector<8x128xf32>
      %439 = vector.broadcast %437 : f32 to vector<8x128xf32>
      %440 = arith.mulf %439, %438 : vector<8x128xf32>
      %441 = arith.addf %428, %440 : vector<8x128xf32>
      %442 = vector.broadcast %cst_5 : f32 to vector<8x128xf32>
      %443 = arith.select %13, %441, %442 : vector<8x128xi1>, vector<8x128xf32>
      %444 = arith.index_cast %23 : i32 to index
      %c0_16 = arith.constant 0 : index
      %445 = vector.load %arg7[%444, %c0_16] : memref<16x128xf32, #tpu.memory_space<vmem>>, vector<8x128xf32>
      tpu.vector_store %arg7[%444, %c0_16], %443 {strides = array<i32>} : memref<16x128xf32, #tpu.memory_space<vmem>>, vector<8x128xf32>,
      %c1_i32_17 = arith.constant 1 : i32
    }
    %c2_i32_6 = arith.constant 2 : i32
    return
  }
  func.func @transform_0(%arg0: i32, %arg1: memref<2xi32, #tpu.memory_space<smem>>, %arg2: memref<65xf32, #tpu.memory_space<smem>>) -> (i32, i32) {
    %c0_i32 = arith.constant 0 : i32
    %c0_i32_0 = arith.constant 0 : i32
    return %arg0, %c0_i32 : i32, i32
  }
  func.func @transform_1(%arg0: i32, %arg1: memref<2xi32, #tpu.memory_space<smem>>, %arg2: memref<65xf32, #tpu.memory_space<smem>>) -> (i32, i32) {
    %c0_i32 = arith.constant 0 : i32
    %c0_i32_0 = arith.constant 0 : i32
    return %arg0, %c0_i32 : i32, i32
  }
  func.func @transform_2(%arg0: i32, %arg1: memref<2xi32, #tpu.memory_space<smem>>, %arg2: memref<65xf32, #tpu.memory_space<smem>>) -> (i32, i32) {
    %c0_i32 = arith.constant 0 : i32
    %c0_i32_0 = arith.constant 0 : i32
    %c0_i32_1 = arith.constant 0 : i32
    return %c0_i32, %c0_i32_0 : i32, i32
  }
  func.func @transform_3(%arg0: i32, %arg1: memref<2xi32, #tpu.memory_space<smem>>, %arg2: memref<65xf32, #tpu.memory_space<smem>>) -> (i32, i32) {
    %c0_i32 = arith.constant 0 : i32
    %c0_i32_0 = arith.constant 0 : i32
    %c0_i32_1 = arith.constant 0 : i32
    return %c0_i32, %c0_i32_0 : i32, i32
  }
  func.func @transform_4(%arg0: i32, %arg1: memref<2xi32, #tpu.memory_space<smem>>, %arg2: memref<65xf32, #tpu.memory_space<smem>>) -> (i32, i32) {
    %c0_i32 = arith.constant 0 : i32
    %c0_i32_0 = arith.constant 0 : i32
    return %arg0, %c0_i32 : i32, i32
  }
}

</mosaic_0001>

<bundles_post_ra>
// kernel: tpu_custom_call.1
= control target key start
LH: loop header
LB: loop body
LE: loop exit
PB: predicated region body
PF: predicated region fallthrough
CT: control target
= control target key end

     0   :  { %s1083_s27 = smov [#allocation4]   ;;  %s1084_s28 = smov [#allocation5]   ;;  %s1470_s0 = inlined_call_operand.hbm [shape: s32[2], index: 0, kind: input, shape index: {}]   ;;  %s1471_s2 = inlined_call_operand.hbm [shape: f32[64,128], index: 2, kind: input, shape index: {}]   ;;  %s1472_s3 = inlined_call_operand.hbm [shape: f32[16,32], index: 3, kind: input, shape index: {}]   ;;  %s1473_s4 = inlined_call_operand.hbm [shape: f32[32,32], index: 4, kind: input, shape index: {}]   ;;  %s1474_s5 = inlined_call_operand.hbm [shape: f32[32,32], index: 5, kind: input, shape index: {}]   ;;  %s1475_s6 = inlined_call_operand.hbm [shape: f32[16,128], index: 6, kind: output, shape index: {}]   ;;  %s1476_s1 = inlined_call_operand.hbm [shape: f32[65], index: 1, kind: input, shape index: {}]  }
   0x1   :  { %s12_s23 = sshll.u32 %s1470_s0, 4  ;;  %s17_s26 = sshll.u32 %s1476_s1, 4  ;;  %s13_s23 = int_to_ptr.hbm [resolvable:$true] %s12_s23  ;;  %s18_s26 = int_to_ptr.hbm [resolvable:$true] %s17_s26 }
   0x2   :  { %15 = dma.hbm_to_smem %s13_s23, 16, %s1083_s27, [#allocation3] }
   0x3   :  { %20 = dma.hbm_to_smem %s18_s26, 16, %s1084_s28, [#allocation3] }
   0x4   :  { %1069 = dma.done.wait [#allocation3], 32 }
   0x5   :  { %1070 = vsyncadd [#allocation3], 4294967264 }
   0x6   :  { %23 = sfence }
   0x7   :  { %24 = vsyncpa [#allocation7], 0 }
   0x8   :  { %25 = vsyncpa [#allocation10], 0 }
   0x9   :  { %26 = vsyncpa [#allocation13], 0 }
   0xa   :  { %27 = vsyncpa [#allocation8], 0  ;;  %s45_s0 = sshll.u32 %s1472_s3, 4  ;;  %s1085_s7 = smov [#allocation9]   ;;  %s46_s0 = int_to_ptr.hbm [resolvable:$true] %s45_s0 }
   0xb   :  { %s47_s1 = sshll.u32 %s1085_s7, 4  ;;  %s32_s10 = sshll.u32 %s1471_s2, 4  ;;  %s48_s1 = int_to_ptr.vmem [resolvable:$true] %s47_s1  ;;  %s33_s10 = int_to_ptr.hbm [resolvable:$true] %s32_s10 }
   0xc   :  { %s1086_s11 = smov 128   ;;  %s1087_s12 = smov 8  }
   0xd   :  { %53 = dma.hbm_to_vmem [thread:$0]  %s46_s0, 256, %s48_s1, [#allocation10], %s1086_s11, %s1086_s11, %s1087_s12  }
   0xe   :  { %s1088_s13 = smov [#allocation6]   ;;  %s58_s3 = sshll.u32 %s1473_s4, 4  ;;  %s59_s3 = int_to_ptr.hbm [resolvable:$true] %s58_s3 }
   0xf   :  { %s34_s14 = sshll.u32 %s1088_s13, 4  ;;  %s71_s18 = sshll.u32 %s1474_s5, 4  ;;  %s35_s14 = int_to_ptr.vmem [resolvable:$true] %s34_s14  ;;  %s72_s18 = int_to_ptr.hbm [resolvable:$true] %s71_s18 }
  0x10   :  { %40 = dma.hbm_to_vmem [thread:$0]  %s33_s10, 1024, %s35_s14, [#allocation7], %s1086_s11, %s1086_s11, %s1087_s12  }
  0x11   :  { %s1089_s19 = smov [#allocation11]   ;;  %s1090_s21 = smov [#allocation12]  }
  0x12   :  { %s60_s20 = sshll.u32 %s1089_s19, 4  ;;  %s73_s4 = sshll.u32 %s1090_s21, 4  ;;  %s61_s20 = int_to_ptr.vmem [resolvable:$true] %s60_s20  ;;  %s74_s4 = int_to_ptr.vmem [resolvable:$true] %s73_s4 }
  0x13   :  { %66 = dma.hbm_to_vmem [thread:$0]  %s59_s3, 512, %s61_s20, [#allocation10], %s1086_s11, %s1086_s11, %s1087_s12  }
  0x14   :  { %79 = dma.hbm_to_vmem [thread:$0]  %s72_s18, 512, %s74_s4, [#allocation13], %s1086_s11, %s1086_s11, %s1087_s12  }
  0x15   :  { %1071 = dma.done.wait [#allocation7], 1024  }
  0x16   :  { %1072 = vsyncadd [#allocation7], 4294966272 }
  0x17   :  { %1073 = dma.done.wait [#allocation10], 768  }
  0x18   :  { %1074 = vsyncadd [#allocation10], 4294966528 }
  0x19   :  { %1075 = dma.done.wait [#allocation13], 512  }
  0x1a   :  { %1076 = vsyncadd [#allocation13], 4294966784  ;;  %s1189_s5 = sld [smem:[#allocation5 + $0x40]]  ;;  %v101_v1 = vld [vmem:[#allocation12 + $0x18] sm:$0xff]  ;;  %v100_v2 = vld [vmem:[#allocation12 + $0x10] sm:$0xff]  ;;  %vm102_vm0 = vcmask 261120   ;;  %v135_v7 = vlaneseq }
  0x1b   :  { %121 = vmatpush.msra.mxu0 %v101_v1  ;;  %759 = vmatpush.msra.mxu1 %v101_v1  ;;  %v99_v3 = vld [vmem:[#allocation12 + $0x8] sm:$0xff]  ;;  %v98_v4 = vld [vmem:[#allocation12] sm:$0xff]  ;;  %v96_v5 = vld [vmem:[#allocation9] sm:$0xff]  ;;  %s1198_s22 = smov 0  }
  0x1c   :  { %v97_v6 = vld [vmem:[#allocation9 + $0x8] sm:$0xff]  ;;  %v1194_v8 = vand.u32 127, %v135_v7 }
  0x1d   :  { %122 = vmatpush.msra.mxu0 %v100_v2  ;;  %760 = vmatpush.msra.mxu1 %v100_v2 }
  0x1f   :  { %123 = vmatpush.msra.mxu0 %v99_v3  ;;  %761 = vmatpush.msra.mxu1 %v99_v3 }
  0x20   :  { %v137_v0 = vstv %s1189_s5 }
  0x21   :  { %124 = vmatpush.msra.mxu0 %v98_v4  ;;  %762 = vmatpush.msra.mxu1 %v98_v4 }
  0x22   :  { %687 = vmatmul.msk.f32.vlgmr.msra.gmra.mxu0 %vm102_vm0, %v96_v5  ;;  %688 = vmatmul.msk.f32.vlgmr.msra.gmra.mxu1 %vm102_vm0, %v97_v6 }
  0x9f   :  { %v126_v9 = vpop.f32.mrf.mxu0  ;;  %v129_v10 = vpop.f32.mrf.mxu1 }
  0xa0   :  { %132 = vst.msk [vmem:[#allocation2] sm:$0xff] %vm102_vm0, %v126_v9 }
  0xa1   :  { %133 = vst.msk [vmem:[#allocation2 + $0x8] sm:$0xff] %vm102_vm0, %v129_v10 }
  0xa2 LB: > { %v1091_v11 = vmov 2   ;;  %v1092_v12 = vmov 0   ;;  %s695_s23 = sshll.u32 %s1081_s22, 3  ;;  %s690_s24 = sshll.u32 %s1081_s22, 5  ;;  %v1093_v13 = vmov 4   ;;  %v155_v19 = vld [vmem:[#allocation11] sm:$0xff]  ;;  %s1081_s22 = sphi %s1198_s22, %s143_s22  }
  0xa3   : > { %826 = vset.pattern.permute.xlu1 %v1091_v11  ;;  %824 = vset.pattern.permute.xlu0 %v1092_v12  ;;  %s201_s25 = scalar_lea.vmem [#allocation2], %s695_s23  ;;  %s150_s26 = scalar_lea.vmem [#allocation6], %s690_s24  ;;  %v156_v20 = vld [vmem:[#allocation11 + $0x8] sm:$0xff]  ;;  %v1094_v21 = vmov 3   ;;  %v1095_v22 = vmov 1   ;;  %v1096_v23 = vmov 5  }
  0xa4   : > { %828 = vset.pattern.permute.xlu2 %v1093_v13  ;;  %v154_v15 = vld [vmem:[%s150_s26 + $0x18] sm:$0xff]  ;;  %v153_v16 = vld [vmem:[%s150_s26 + $0x10] sm:$0xff]  ;;  %v152_v17 = vld [vmem:[%s150_s26 + $0x8] sm:$0xff]  ;;  %v1097_v25 = vmov 6   ;;  %v1098_v26 = vmov 8   ;;  %v1099_v27 = vmov 7  }
  0xa5   : > { %183 = vmatpush.msra.mxu0 %v154_v15  ;;  %763 = vmatpush.msra.mxu1 %v154_v15  ;;  %v151_v18 = vld [vmem:[%s150_s26] sm:$0xff]  ;;  %v157_v24 = vld [vmem:[#allocation11 + $0x10] sm:$0xff]  ;;  %v158_v28 = vld [vmem:[#allocation11 + $0x18] sm:$0xff]  ;;  %v1100_v29 = vmov 9   ;;  %v1101_v30 = vmov 13   ;;  %v1102_v31 = vmov 10  }
  0xa6   : > { %764 = vmatpush.msra.mxu2 %v154_v15  ;;  %765 = vmatpush.msra.mxu3 %v154_v15  ;;  %v1103_v32 = vmov 11   ;;  %v1104_v33 = vmov 18   ;;  %v1105_v34 = vmov 12   ;;  %v1106_v35 = vmov 14   ;;  %s696_s27 = sld [smem:[#allocation5 + $0x20]] }
  0xa7   : > { %184 = vmatpush.msra.mxu0 %v153_v16  ;;  %766 = vmatpush.msra.mxu1 %v153_v16  ;;  %v1107_v36 = vmov 23   ;;  %v1108_v37 = vmov 15   ;;  %v1109_v38 = vmov 16   ;;  %v1110_v39 = vmov 17   ;;  %s699_s28 = sld [smem:[#allocation5 + $0x22]] }
  0xa8   : > { %v1207_v14 = vld [vmem:[%s201_s25] sm:$0xff]  ;;  %767 = vmatpush.msra.mxu2 %v153_v16  ;;  %768 = vmatpush.msra.mxu3 %v153_v16  ;;  %v1111_v40 = vmov 28   ;;  %v1112_v41 = vmov 19   ;;  %v1113_v42 = vmov 20   ;;  %v1114_v43 = vmov 31   ;;  %s697_s29 = sld [smem:[#allocation5 + $0x21]] }
  0xa9   : > { %236 = vperm.xlu1 %826, %v1207_v14   ;;  %208 = vperm.xlu0 %824, %v1207_v14   ;;  %v1115_v44 = vmov 21   ;;  %v1116_v45 = vmov 22   ;;  %v1117_v46 = vmov 24   ;;  %v1118_v47 = vmov 25   ;;  %s701_s30 = sld [smem:[#allocation5 + $0x23]] }
  0xaa   : > { %264 = vperm.xlu2 %828, %v1207_v14   ;;  %185 = vmatpush.msra.mxu0 %v152_v17  ;;  %v1119_v48 = vmov 26   ;;  %v1120_v49 = vmov 27   ;;  %v1121_v50 = vmov 29   ;;  %v1122_v51 = vmov 30   ;;  %s703_s0 = sld [smem:[#allocation5 + $0x24]] }
  0xab   : > { %769 = vmatpush.msra.mxu1 %v152_v17  ;;  %770 = vmatpush.msra.mxu2 %v152_v17  ;;  %s1251_s7 = sld [smem:[#allocation5 + $0x25]] }
  0xac   : > { %186 = vmatpush.msra.mxu0 %v151_v18  ;;  %771 = vmatpush.msra.mxu3 %v152_v17  ;;  %v204_v58 = vstv %s696_s27  ;;  %s1253_s1 = sld [smem:[#allocation5 + $0x26]] }
  0xad   : > { %691 = vmatmul.msk.f32.vlgmr.msra.gmra.mxu0 %vm102_vm0, %v155_v19  ;;  %772 = vmatpush.msra.mxu1 %v151_v18  ;;  %v233_v59 = vstv %s699_s28  ;;  %s1257_s8 = sld [smem:[#allocation5 + $0x27]] }
  0xae   : > { %692 = vmatmul.msk.f32.vlgmr.msra.gmra.mxu1 %vm102_vm0, %v156_v20  ;;  %773 = vmatpush.msra.mxu2 %v151_v18  ;;  %v219_v60 = vstv %s697_s29  ;;  %s1259_s9 = sld [smem:[#allocation5 + $0x28]] }
  0xaf   : > { %693 = vmatmul.msk.f32.vlgmr.msra.gmra.mxu2 %vm102_vm0, %v157_v24  ;;  %774 = vmatpush.msra.mxu3 %v151_v18  ;;  %v247_v2 = vstv %s701_s30  ;;  %s1263_s10 = sld [smem:[#allocation5 + $0x29]] }
  0xb0   : > { %694 = vmatmul.msk.f32.vlgmr.msra.gmra.mxu3 %vm102_vm0, %v158_v28  ;;  %v261_v6 = vstv %s703_s0  ;;  %s1265_s13 = sld [smem:[#allocation5]] }
  0xb1   : > { %827 = vset.pattern.permute.xlu1 %v1094_v21  ;;  %825 = vset.pattern.permute.xlu0 %v1095_v22  ;;  %v275_v11 = vstv %s1251_s7  ;;  %s1268_s14 = sld [smem:[#allocation5 + $0x2a]] }
  0xb2   : > { %250 = vperm.xlu1 %827, %v1207_v14   ;;  %222 = vperm.xlu0 %825, %v1207_v14   ;;  %s1270_s15 = sld [smem:[#allocation5 + $0x1]] }
  0xb3   : > { %829 = vset.pattern.permute.xlu2 %v1096_v23  ;;  %s1273_s16 = sld [smem:[#allocation5 + $0x2c]]  ;;  %v303_v18 = vstv %s1257_s8 }
  0xb4   : > { %278 = vperm.xlu2 %829, %v1207_v14   ;;  %s1276_s3 = sld [smem:[#allocation5 + $0x2]]  ;;  %v317_v21 = vstv %s1259_s9 }
  0xb5   : > { %s1280_s2 = sld [smem:[#allocation5 + $0x2b]] }
  0xb6   : > { %s1283_s17 = sld [smem:[#allocation5 + $0x3]] }
  0xb7   : > { %s1287_s18 = sld [smem:[#allocation5 + $0x2d]] }
  0xb8   : > { %s1290_s19 = sld [smem:[#allocation5 + $0x4]] }
  0xb9   : > { %s1296_s20 = sld [smem:[#allocation5 + $0x2f]] }
  0xba   : > { %830 = vset.pattern.permute.xlu1 %v1097_v25  ;;  %832 = vset.pattern.permute.xlu0 %v1098_v26  ;;  %s1299_s21 = sld [smem:[#allocation5 + $0x2e]] }
  0xbb   : > { %292 = vperm.xlu1 %830, %v1207_v14   ;;  %320 = vperm.xlu0 %832, %v1207_v14   ;;  %s1307_s4 = sld [smem:[#allocation5 + $0x5]] }
  0xbc   : > { %831 = vset.pattern.permute.xlu2 %v1099_v27  ;;  %s1312_s24 = sld [smem:[#allocation5 + $0x30]] }
  0xbd   : > { %306 = vperm.xlu2 %831, %v1207_v14   ;;  %s1314_s25 = sld [smem:[#allocation5 + $0x7]] }
  0xbe   : > { %s1322_s26 = sld [smem:[#allocation5 + $0x6]] }
  0xbf   : > { %s1327_s27 = sld [smem:[#allocation5 + $0x31]] }
  0xc0   : > { %s1329_s28 = sld [smem:[#allocation5 + $0x8]] }
  0xc1   : > { %s1335_s29 = sld [smem:[#allocation5 + $0x9]] }
  0xc2   : > { %s1343_s30 = sld [smem:[#allocation5 + $0x32]] }
  0xc3   : > { %833 = vset.pattern.permute.xlu1 %v1100_v29  ;;  %837 = vset.pattern.permute.xlu0 %v1101_v30  ;;  %v215_v29 = vstv %s1265_s13  ;;  %s1346_s0 = sld [smem:[#allocation5 + $0xa]] }
  0xc4   : > { %334 = vperm.xlu1 %833, %v1207_v14   ;;  %390 = vperm.xlu0 %837, %v1207_v14   ;;  %s1350_s7 = sld [smem:[#allocation5 + $0x33]] }
  0xc5   : > { %834 = vset.pattern.permute.xlu2 %v1102_v31  ;;  %s1356_s8 = sld [smem:[#allocation5 + $0xc]] }
  0xc6   : > { %348 = vperm.xlu2 %834, %v1207_v14   ;;  %s1359_s9 = sld [smem:[#allocation5 + $0x34]] }
  0xc7   : > { %s1365_s13 = sld [smem:[#allocation5 + $0xf]] }
  0xcc   : > { %835 = vset.pattern.permute.xlu1 %v1103_v32  ;;  %842 = vset.pattern.permute.xlu0 %v1104_v33  ;;  %v331_v33 = vstv %s1263_s10  ;;  %s1361_s10 = sld [smem:[#allocation5 + $0xd]] }
  0xcd   : > { %362 = vperm.xlu1 %835, %v1207_v14   ;;  %460 = vperm.xlu0 %842, %v1207_v14  }
  0xce   : > { %836 = vset.pattern.permute.xlu2 %v1105_v34 }
  0xcf   : > { %376 = vperm.xlu2 %836, %v1207_v14  }
  0xd5   : > { %838 = vset.pattern.permute.xlu1 %v1106_v35  ;;  %847 = vset.pattern.permute.xlu0 %v1107_v36 }
  0xd6   : > { %404 = vperm.xlu1 %838, %v1207_v14   ;;  %530 = vperm.xlu0 %847, %v1207_v14  }
  0xd7   : > { %839 = vset.pattern.permute.xlu2 %v1108_v37 }
  0xd8   : > { %418 = vperm.xlu2 %839, %v1207_v14  }
  0xde   : > { %840 = vset.pattern.permute.xlu1 %v1109_v38  ;;  %852 = vset.pattern.permute.xlu0 %v1111_v40  ;;  %v345_v38 = vstv %s1268_s14  ;;  %s1368_s14 = sld [smem:[#allocation5 + $0xe]] }
  0xdf   : > { %432 = vperm.xlu1 %840, %v1207_v14   ;;  %600 = vperm.xlu0 %852, %v1207_v14  }
  0xe0   : > { %841 = vset.pattern.permute.xlu2 %v1110_v39  ;;  %v373_v39 = vstv %s1273_s16  ;;  %s1374_s16 = sld [smem:[#allocation5 + $0x10]] }
  0xe1   : > { %446 = vperm.xlu2 %841, %v1207_v14  }
  0xe7   : > { %843 = vset.pattern.permute.xlu1 %v1112_v41  ;;  %856 = vset.pattern.permute.xlu0 %v1114_v43 }
  0xe8   : > { %474 = vperm.xlu1 %843, %v1207_v14  }
  0xe9   : > { %844 = vset.pattern.permute.xlu2 %v1113_v42 }
  0xea   : > { %488 = vperm.xlu2 %844, %v1207_v14  }
  0xf0   : > { %845 = vset.pattern.permute.xlu1 %v1115_v44  ;;  %v359_v44 = vstv %s1280_s2  ;;  %s1384_s2 = sld [smem:[#allocation5 + $0x11]] }
  0xf1   : > { %502 = vperm.xlu1 %845, %v1207_v14  }
  0xf2   : > { %846 = vset.pattern.permute.xlu2 %v1116_v45 }
  0xf3   : > { %516 = vperm.xlu2 %846, %v1207_v14  }
  0xf9   : > { %848 = vset.pattern.permute.xlu1 %v1117_v46 }
  0xfa   : > { %544 = vperm.xlu1 %848, %v1207_v14  }
  0xfb   : > { %849 = vset.pattern.permute.xlu2 %v1118_v47  ;;  %v229_v47 = vstv %s1270_s15  ;;  %s1372_s15 = sld [smem:[#allocation5 + $0x35]] }
  0xfc   : > { %558 = vperm.xlu2 %849, %v1207_v14  }
 0x102   : > { %850 = vset.pattern.permute.xlu1 %v1119_v48 }
 0x103   : > { %572 = vperm.xlu1 %850, %v1207_v14  }
 0x104   : > { %851 = vset.pattern.permute.xlu2 %v1120_v49  ;;  %v1244_v52 = vpop.permute.xlu2 %264 }
 0x105   : > { %586 = vperm.xlu2 %851, %v1207_v14  }
 0x10b   : > { %853 = vset.pattern.permute.xlu1 %v1121_v50 }
 0x10c   : > { %614 = vperm.xlu1 %853, %v1207_v14  }
 0x10d   : > { %854 = vset.pattern.permute.xlu2 %v1122_v51 }
 0x10e   : > { %628 = vperm.xlu2 %854, %v1207_v14   ;;  %v1247_v54 = vpop.permute.xlu2 %278 }
 0x114   : > { %855 = vset.pattern.permute.xlu1 %v1114_v43  ;;  %v243_v43 = vstv %s1276_s3  ;;  %s1378_s3 = sld [smem:[#allocation5 + $0x36]] }
 0x115   : > { %642 = vperm.xlu1 %855, %v1207_v14   ;;  %v289_v14 = vstv %s1253_s1  ;;  %s1352_s1 = sld [smem:[#allocation5 + $0xb]] }
 0x117   : > { %v1249_v56 = vpop.permute.xlu2 %306 }
 0x11b   : > { %v237_v53 = vpop.permute.xlu1 %236  ;;  %v209_v57 = vpop.permute.xlu0 %208 }
 0x120   : > { %v1261_v4 = vpop.permute.xlu2 %348 }
 0x124   : > { %v251_v55 = vpop.permute.xlu1 %250  ;;  %v223_v15 = vpop.permute.xlu0 %222 }
 0x129   : > { %v1292_v30 = vpop.permute.xlu2 %376 }
 0x12a   : > { %v188_v62 = vpop.f32.mrf.mxu0 }
 0x12b   : > { %v205_v63 = vadd.f32 %v204_v58, %v188_v62  ;;  %v234_v1 = vadd.f32 %v233_v59, %v188_v62  ;;  %v220_v3 = vadd.f32 %v219_v60, %v188_v62  ;;  %v248_v7 = vadd.f32 %v247_v2, %v188_v62  ;;  %v1285_v26 = vpop.f32.mrf.mxu1 }
 0x12c   : > { %v262_v12 = vadd.f32 %v261_v6, %v188_v62  ;;  %v276_v17 = vadd.f32 %v275_v11, %v188_v62  ;;  %v290_v23 = vadd.f32 %v289_v14, %v188_v62  ;;  %v304_v25 = vadd.f32 %v303_v18, %v188_v62 }
 0x12d   : > { %v1255_v61 = vpop.permute.xlu1 %292  ;;  %v211_v5 = vperm.slane %v205_v63, 0  ;;  %v239_v10 = vperm.slane %v234_v1, 2  ;;  %v225_v13 = vperm.slane %v220_v3, 1  ;;  %v253_v16 = vperm.slane %v248_v7, 3  ;;  %v321_v45 = vpop.permute.xlu0 %320 }
 0x12e   : > { %v267_v22 = vperm.slane %v262_v12, 4  ;;  %v281_v28 = vperm.slane %v276_v17, 5  ;;  %v318_v31 = vadd.f32 %v317_v21, %v1285_v26  ;;  %v295_v35 = vperm.slane %v290_v23, 6 }
 0x12f   : > { %v212_v9 = vadd.f32 %v211_v5, %v209_v57  ;;  %v240_v19 = vadd.f32 %v239_v10, %v237_v53  ;;  %v226_v24 = vadd.f32 %v225_v13, %v223_v15  ;;  %v254_v27 = vadd.f32 %v253_v16, %v251_v55 }
 0x130   : > { %v268_v34 = vadd.f32 %v267_v22, %v1244_v52  ;;  %v309_v36 = vperm.slane %v304_v25, 7  ;;  %v282_v40 = vadd.f32 %v281_v28, %v1247_v54  ;;  %v332_v41 = vadd.f32 %v331_v33, %v1285_v26 }
 0x131   : > { %857 = vtanh.f32 %v212_v9  ;;  %v323_v42 = vperm.slane %v318_v31, 0  ;;  %v296_v46 = vadd.f32 %v295_v35, %v1255_v61  ;;  %v346_v48 = vadd.f32 %v345_v38, %v1285_v26 }
 0x132   : > { %859 = vtanh.f32 %v240_v19  ;;  %v310_v51 = vadd.f32 %v309_v36, %v1249_v56  ;;  %v374_v53 = vadd.f32 %v373_v39, %v1285_v26  ;;  %v387_v54 = vstv %s1287_s18  ;;  %v419_v3 = vpop.permute.xlu2 %418  ;;  %v1340_v22 = vpop.f32.mrf.mxu2  ;;  %s1392_s18 = sld [smem:[#allocation5 + $0x38]] }
 0x133   : > { %861 = vtanh.f32 %v226_v24  ;;  %v337_v57 = vperm.slane %v332_v41, 1  ;;  %v360_v58 = vadd.f32 %v359_v44, %v1285_v26  ;;  %v324_v59 = vadd.f32 %v323_v42, %v321_v45 }
 0x134   : > { %863 = vtanh.f32 %v254_v27  ;;  %v257_v60 = vstv %s1283_s17  ;;  %v271_v61 = vstv %s1290_s19  ;;  %v415_v63 = vstv %s1296_s20  ;;  %s1388_s17 = sld [smem:[#allocation5 + $0x37]] }
 0x135   : > { %865 = vtanh.f32 %v268_v34  ;;  %v351_v1 = vperm.slane %v346_v48, 2  ;;  %v401_v2 = vstv %s1299_s21  ;;  %v388_v5 = vadd.f32 %v387_v54, %v1285_v26  ;;  %s1396_s19 = sld [smem:[#allocation5 + $0x12]] }
 0x136   : > { %v1278_v20 = vpop.permute.xlu1 %334  ;;  %867 = vtanh.f32 %v282_v40  ;;  %v379_v9 = vperm.slane %v374_v53, 4  ;;  %v365_v12 = vperm.slane %v360_v58, 3  ;;  %v416_v13 = vadd.f32 %v415_v63, %v1285_v26  ;;  %s1399_s20 = sld [smem:[#allocation5 + $0x39]] }
 0x137   : > { %v858_v32 = vpop.eup %857  ;;  %869 = vtanh.f32 %v296_v46  ;;  %v338_v11 = vadd.f32 %v337_v57, %v1278_v20  ;;  %v285_v16 = vstv %s1307_s4  ;;  %v352_v18 = vadd.f32 %v351_v1, %v1261_v4  ;;  %s1401_s21 = sld [smem:[#allocation5 + $0x13]] }
 0x138   : > { %v216_v37 = vmul.f32 %v858_v32, %v215_v29  ;;  %v860_v50 = vpop.eup %859  ;;  %871 = vtanh.f32 %v310_v51  ;;  %v402_v19 = vadd.f32 %v401_v2, %v1285_v26  ;;  %v393_v21 = vperm.slane %v388_v5, 5  ;;  %v391_v29 = vpop.permute.xlu0 %390  ;;  %s1406_s4 = sld [smem:[#allocation5 + $0x14]] }
 0x139   : > { %v862_v55 = vpop.eup %861  ;;  %v244_v7 = vmul.f32 %v860_v50, %v243_v43  ;;  %873 = vtanh.f32 %v324_v59  ;;  %v429_v23 = vstv %s1312_s24  ;;  %v313_v20 = vstv %s1314_s25  ;;  %s1412_s24 = sld [smem:[#allocation5 + $0x3a]] }
 0x13a   : > { %v217_v52 = vadd.f32 %v216_v37, %v137_v0  ;;  %v230_v62 = vmul.f32 %v862_v55, %v229_v47  ;;  %v864_v56 = vpop.eup %863  ;;  %v380_v27 = vadd.f32 %v379_v9, %v1292_v30  ;;  %875 = vtanh.f32 %v338_v11  ;;  %s1414_s25 = sld [smem:[#allocation5 + $0x3b]] }
 0x13b   : > { %v866_v10 = vpop.eup %865  ;;  %v258_v15 = vmul.f32 %v864_v56, %v257_v60  ;;  %v299_v31 = vstv %s1322_s26  ;;  %v421_v32 = vperm.slane %v416_v13, 7  ;;  %v443_v36 = vstv %s1327_s27  ;;  %v447_v44 = vpop.permute.xlu2 %446  ;;  %s1417_s26 = sld [smem:[#allocation5 + $0x15]] }
 0x13c   : > { %v231_v6 = vadd.f32 %v230_v62, %v217_v52  ;;  %v868_v17 = vpop.eup %867  ;;  %v272_v25 = vmul.f32 %v866_v10, %v271_v61  ;;  %v430_v37 = vadd.f32 %v429_v23, %v1340_v22  ;;  %877 = vtanh.f32 %v352_v18  ;;  %s1422_s27 = sld [smem:[#allocation5 + $0x3c]] }
 0x13d   : > { %v870_v4 = vpop.eup %869  ;;  %v286_v35 = vmul.f32 %v868_v17, %v285_v16  ;;  %v327_v30 = vstv %s1329_s28  ;;  %v407_v39 = vperm.slane %v402_v19, 6  ;;  %v394_v40 = vadd.f32 %v393_v21, %v391_v29  ;;  %s1424_s28 = sld [smem:[#allocation5 + $0x16]] }
 0x13e   : > { %v245_v14 = vadd.f32 %v244_v7, %v231_v6  ;;  %v872_v33 = vpop.eup %871  ;;  %879 = vtanh.f32 %v380_v27  ;;  %v300_v42 = vmul.f32 %v870_v4, %v299_v31  ;;  %v422_v43 = vadd.f32 %v421_v32, %v419_v3 }
 0x13f   : > { %v363_v49 = vpop.permute.xlu1 %362  ;;  %v874_v38 = vpop.eup %873  ;;  %v444_v45 = vadd.f32 %v443_v36, %v1340_v22  ;;  %v314_v46 = vmul.f32 %v872_v33, %v313_v20  ;;  %v341_v51 = vstv %s1335_s29  ;;  %v457_v53 = vstv %s1343_s30  ;;  %s1431_s29 = sld [smem:[#allocation5 + $0x17]] }
 0x140   : > { %v259_v24 = vadd.f32 %v258_v15, %v245_v14  ;;  %v366_v26 = vadd.f32 %v365_v12, %v363_v49  ;;  %v328_v48 = vmul.f32 %v874_v38, %v327_v30  ;;  %v435_v49 = vperm.slane %v430_v37, 0  ;;  %v876_v50 = vpop.eup %875  ;;  %v461_v19 = vpop.permute.xlu0 %460  ;;  %s1433_s30 = sld [smem:[#allocation5 + $0x18]] }
 0x141   : > { %v355_v57 = vstv %s1346_s0  ;;  %v449_v58 = vperm.slane %v444_v45, 1  ;;  %v471_v60 = vstv %s1350_s7  ;;  %v342_v62 = vmul.f32 %v876_v50, %v341_v51  ;;  %s1437_s0 = sld [smem:[#allocation5 + $0x3d]] }
 0x142   : > { %v273_v34 = vadd.f32 %v272_v25, %v259_v24  ;;  %881 = vtanh.f32 %v366_v26  ;;  %v878_v55 = vpop.eup %877  ;;  %v458_v1 = vadd.f32 %v457_v53, %v1340_v22  ;;  %v369_v3 = vstv %s1352_s1  ;;  %v1409_v53 = vpop.f32.mrf.mxu3  ;;  %s1439_s7 = sld [smem:[#allocation5 + $0x3e]] }
 0x143   : > { %883 = vtanh.f32 %v394_v40  ;;  %v356_v5 = vmul.f32 %v878_v55, %v355_v57  ;;  %v485_v7 = vstv %s1359_s9  ;;  %v472_v9 = vadd.f32 %v471_v60, %v1340_v22  ;;  %s1443_s1 = sld [smem:[#allocation5 + $0x19]] }
 0x144   : > { %v287_v41 = vadd.f32 %v286_v35, %v273_v34  ;;  %885 = vtanh.f32 %v422_v43  ;;  %v880_v61 = vpop.eup %879  ;;  %v383_v11 = vstv %s1356_s8  ;;  %v397_v12 = vstv %s1361_s10  ;;  %v489_v21 = vpop.permute.xlu2 %488  ;;  %s1447_s8 = sld [smem:[#allocation5 + $0x1a]] }
 0x145   : > { %v450_v13 = vadd.f32 %v449_v58, %v447_v44  ;;  %v463_v16 = vperm.slane %v458_v1, 2  ;;  %v425_v18 = vstv %s1365_s13  ;;  %v486_v23 = vadd.f32 %v485_v7, %v1340_v22  ;;  %s757_s9 = sld [smem:[#allocation5 + $0x3f]] }
 0x146   : > { %v301_v47 = vadd.f32 %v300_v42, %v287_v41  ;;  %v384_v20 = vmul.f32 %v880_v61, %v383_v11  ;;  %v477_v27 = vperm.slane %v472_v9, 3  ;;  %v411_v29 = vstv %s1368_s14  ;;  %s750_s10 = sld [smem:[#allocation5 + $0x1b]] }
 0x147   : > { %v499_v4 = vstv %s1372_s15  ;;  %v464_v31 = vadd.f32 %v463_v16, %v461_v19  ;;  %v439_v34 = vstv %s1374_s16  ;;  %v491_v35 = vperm.slane %v486_v23, 4  ;;  %s752_s13 = sld [smem:[#allocation5 + $0x1c]] }
 0x148   : > { %v405_v28 = vpop.permute.xlu1 %404  ;;  %v315_v54 = vadd.f32 %v314_v46, %v301_v47  ;;  %v882_v2 = vpop.eup %881  ;;  %v513_v36 = vstv %s1378_s3  ;;  %v500_v40 = vadd.f32 %v499_v4, %v1340_v22  ;;  %v453_v43 = vstv %s1384_s2  ;;  %s754_s14 = sld [smem:[#allocation5 + $0x1d]]  ;;  %s653_s2 = scalar_lea.vmem [#allocation14], %s695_s23 }
 0x149   : > { %v408_v52 = vadd.f32 %v407_v39, %v405_v28  ;;  %v884_v10 = vpop.eup %883  ;;  %v370_v14 = vmul.f32 %v882_v2, %v369_v3  ;;  %v514_v42 = vadd.f32 %v513_v36, %v1340_v22  ;;  %v527_v45 = vstv %s1388_s17  ;;  %s756_s15 = sld [smem:[#allocation5 + $0x1e]] }
 0x14a   : > { %v329_v63 = vadd.f32 %v328_v48, %v315_v54  ;;  %v886_v17 = vpop.eup %885  ;;  %v398_v25 = vmul.f32 %v884_v10, %v397_v12  ;;  %v492_v48 = vadd.f32 %v491_v35, %v489_v21  ;;  %v541_v54 = vstv %s1392_s18  ;;  %s758_s16 = sld [smem:[#allocation5 + $0x1f]] }
 0x14b   : > { %887 = vtanh.f32 %v408_v52  ;;  %v426_v33 = vmul.f32 %v886_v17, %v425_v18  ;;  %v519_v51 = vperm.slane %v514_v42, 6  ;;  %v528_v52 = vadd.f32 %v527_v45, %v1340_v22  ;;  %s146_s3 = sld [smem:[#allocation4 + %s1081_s22]]  ;;  %s143_s22 = sadd.s32 1, %s1081_s22  }
 0x14c   : > { %v343_v6 = vadd.f32 %v342_v62, %v329_v63  ;;  %v467_v60 = vstv %s1396_s19  ;;  %v555_v62 = vstv %s1399_s20  ;;  %v542_v22 = vadd.f32 %v541_v54, %v1409_v53  ;;  %p140_p0 = scmp.ge.s32.totalorder %s143_s22, 2  }
 0x14d   : > { %v517_v50 = vpop.permute.xlu2 %516  ;;  %v533_v2 = vperm.slane %v528_v52, 7  ;;  %v556_v7 = vadd.f32 %v555_v62, %v1409_v53  ;;  %v495_v12 = vstv %s1406_s4  ;;  %v583_v16 = vstv %s1414_s25  ;;  %s661_s19 = sshll.u32 (%p140_p0), %s1475_s6, 4  ;;  %s1123_s20 = smov (%p140_p0), [#allocation14]   ;;  %s662_s19 = int_to_ptr.hbm [resolvable:$true] %s661_s19 }
 0x14e   : > { %v357_v15 = vadd.f32 %v356_v5, %v343_v6  ;;  %v520_v1 = vadd.f32 %v519_v51, %v517_v50  ;;  %v531_v6 = vpop.permute.xlu0 %530  ;;  %v547_v10 = vperm.slane %v542_v22, 0  ;;  %v569_v17 = vstv %s1412_s24 }
 0x14f   : > { %v509_v19 = vstv %s1417_s26  ;;  %v561_v21 = vperm.slane %v556_v7, 1  ;;  %v597_v4 = vstv %s1422_s27  ;;  %v625_v50 = vstv %s1439_s7 }
 0x150   : > { %v371_v24 = vadd.f32 %v370_v14, %v357_v15  ;;  %v598_v36 = vadd.f32 %v597_v4, %v1409_v53  ;;  %v639_v7 = vstv %s757_s9 }
 0x151   : > { %v433_v59 = vpop.permute.xlu1 %432  ;;  %v888_v28 = vpop.eup %887 }
 0x152   : > { %v436_v56 = vadd.f32 %v435_v49, %v433_v59  ;;  %v385_v26 = vadd.f32 %v384_v20, %v371_v24  ;;  %v412_v38 = vmul.f32 %v888_v28, %v411_v29  ;;  %v505_v49 = vperm.slane %v500_v40, 5 }
 0x153   : > { %v570_v28 = vadd.f32 %v569_v17, %v1409_v53  ;;  %v551_v40 = vstv %s1433_s30  ;;  %v607_v17 = vstv %s752_s13 }
 0x154   : > { %889 = vtanh.f32 %v436_v56  ;;  %v399_v30 = vadd.f32 %v398_v25, %v385_v26  ;;  %v481_v56 = vstv %s1401_s21  ;;  %s659_s21 = sshll.u32 (%p140_p0), %s1123_s20, 4  ;;  %s660_s21 = int_to_ptr.vmem [resolvable:$true] %s659_s21 }
 0x155   : > { %891 = vtanh.f32 %v450_v13  ;;  %v534_v13 = vadd.f32 %v533_v2, %v531_v6  ;;  %v575_v35 = vperm.slane %v570_v28, 2 }
 0x156   : > { %v413_v41 = vadd.f32 %v412_v38, %v399_v30  ;;  %893 = vtanh.f32 %v464_v31  ;;  %v559_v15 = vpop.permute.xlu2 %558  ;;  %v523_v31 = vstv %s1424_s28  ;;  %v601_v51 = vpop.permute.xlu0 %600 }
 0x158   : > { %v427_v47 = vadd.f32 %v426_v33, %v413_v41 }
 0x15a   : > { %v475_v32 = vpop.permute.xlu1 %474  ;;  %v890_v37 = vpop.eup %889 }
 0x15b   : > { %v478_v39 = vadd.f32 %v477_v27, %v475_v32  ;;  %v440_v44 = vmul.f32 %v890_v37, %v439_v34  ;;  %v892_v46 = vpop.eup %891  ;;  %v584_v27 = vadd.f32 %v583_v16, %v1409_v53  ;;  %v562_v32 = vadd.f32 %v561_v21, %v559_v15 }
 0x15c   : > { %v454_v55 = vmul.f32 %v892_v46, %v453_v43  ;;  %v894_v59 = vpop.eup %893  ;;  %v603_v46 = vperm.slane %v598_v36, 4 }
 0x15d   : > { %895 = vtanh.f32 %v478_v39  ;;  %v441_v57 = vadd.f32 %v440_v44, %v427_v47  ;;  %v468_v5 = vmul.f32 %v894_v59, %v467_v60  ;;  %v589_v34 = vperm.slane %v584_v27, 3 }
 0x15e   : > { %897 = vtanh.f32 %v492_v48  ;;  %v537_v39 = vstv %s1431_s29  ;;  %v611_v47 = vstv %s1437_s0  ;;  %v604_v59 = vadd.f32 %v603_v46, %v601_v51 }
 0x15f   : > { %v455_v3 = vadd.f32 %v454_v55, %v441_v57  ;;  %v587_v41 = vpop.permute.xlu2 %586  ;;  %v612_v54 = vadd.f32 %v611_v47, %v1409_v53  ;;  %v565_v57 = vstv %s1443_s1 }
 0x160   : > { %v590_v44 = vadd.f32 %v589_v34, %v587_v41 }
 0x161   : > { %v469_v14 = vadd.f32 %v468_v5, %v455_v3 }
 0x163   : > { %v503_v58 = vpop.permute.xlu1 %502  ;;  %v896_v63 = vpop.eup %895 }
 0x164   : > { %v506_v61 = vadd.f32 %v505_v49, %v503_v58  ;;  %v482_v9 = vmul.f32 %v896_v63, %v481_v56  ;;  %v898_v11 = vpop.eup %897  ;;  %v626_v58 = vadd.f32 %v625_v50, %v1409_v53  ;;  %v617_v63 = vperm.slane %v612_v54, 5 }
 0x165   : > { %v496_v20 = vmul.f32 %v898_v11, %v495_v12 }
 0x166   : > { %899 = vtanh.f32 %v506_v61  ;;  %v483_v24 = vadd.f32 %v482_v9, %v469_v14  ;;  %v579_v61 = vstv %s1447_s8 }
 0x167   : > { %901 = vtanh.f32 %v520_v1  ;;  %v631_v1 = vperm.slane %v626_v58, 6 }
 0x168   : > { %903 = vtanh.f32 %v534_v13  ;;  %v497_v33 = vadd.f32 %v496_v20, %v483_v24  ;;  %v629_v5 = vpop.permute.xlu2 %628  ;;  %v640_v13 = vadd.f32 %v639_v7, %v1409_v53 }
 0x169   : > { %v632_v12 = vadd.f32 %v631_v1, %v629_v5 }
 0x16c   : > { %v900_v18 = vpop.eup %899  ;;  %v545_v23 = vpop.permute.xlu1 %544 }
 0x16d   : > { %v548_v25 = vadd.f32 %v547_v10, %v545_v23  ;;  %v510_v29 = vmul.f32 %v900_v18, %v509_v19  ;;  %v902_v26 = vpop.eup %901  ;;  %v593_v10 = vstv %s750_s10  ;;  %v621_v18 = vstv %s754_s14 }
 0x16e   : > { %v524_v37 = vmul.f32 %v902_v26, %v523_v31  ;;  %v904_v30 = vpop.eup %903  ;;  %v645_v19 = vperm.slane %v640_v13, 7  ;;  %v649_v26 = vstv %s758_s16 }
 0x16f   : > { %905 = vtanh.f32 %v548_v25  ;;  %v511_v38 = vadd.f32 %v510_v29, %v497_v33  ;;  %v538_v49 = vmul.f32 %v904_v30, %v537_v39  ;;  %v635_v29 = vstv %s756_s15 }
 0x170   : > { %907 = vtanh.f32 %v562_v32  ;;  %v147_v32 = vstv %s146_s3 }
 0x171   : > { %v525_v48 = vadd.f32 %v524_v37, %v511_v38  ;;  %vm148_vm1 = vcmp.lt.s32.totalorder %v1194_v8, %v147_v32 }
 0x173   : > { %v539_v60 = vadd.f32 %v538_v49, %v525_v48 }
 0x175   : > { %v573_v42 = vpop.permute.xlu1 %572  ;;  %v906_v43 = vpop.eup %905 }
 0x176   : > { %v576_v45 = vadd.f32 %v575_v35, %v573_v42  ;;  %v552_v52 = vmul.f32 %v906_v43, %v551_v40  ;;  %v908_v55 = vpop.eup %907 }
 0x177   : > { %v566_v62 = vmul.f32 %v908_v55, %v565_v57 }
 0x178   : > { %909 = vtanh.f32 %v576_v45  ;;  %v553_v22 = vadd.f32 %v552_v52, %v539_v60 }
 0x179   : > { %911 = vtanh.f32 %v590_v44 }
 0x17a   : > { %913 = vtanh.f32 %v604_v59  ;;  %v567_v11 = vadd.f32 %v566_v62, %v553_v22 }
 0x17e   : > { %v910_v56 = vpop.eup %909  ;;  %v615_v2 = vpop.permute.xlu1 %614 }
 0x17f   : > { %v580_v3 = vmul.f32 %v910_v56, %v579_v61  ;;  %v618_v6 = vadd.f32 %v617_v63, %v615_v2  ;;  %v912_v9 = vpop.eup %911 }
 0x180   : > { %v594_v14 = vmul.f32 %v912_v9, %v593_v10  ;;  %v914_v16 = vpop.eup %913 }
 0x181   : > { %915 = vtanh.f32 %v618_v6  ;;  %v581_v15 = vadd.f32 %v580_v3, %v567_v11  ;;  %v608_v20 = vmul.f32 %v914_v16, %v607_v17 }
 0x182   : > { %917 = vtanh.f32 %v632_v12 }
 0x183   : > { %v595_v23 = vadd.f32 %v594_v14, %v581_v15 }
 0x185   : > { %v609_v28 = vadd.f32 %v608_v20, %v595_v23 }
 0x187   : > { %v916_v21 = vpop.eup %915  ;;  %v643_v24 = vpop.permute.xlu1 %642 }
 0x188   : > { %v646_v25 = vadd.f32 %v645_v19, %v643_v24  ;;  %v622_v27 = vmul.f32 %v916_v21, %v621_v18  ;;  %v918_v53 = vpop.eup %917 }
 0x189   : > { %v636_v31 = vmul.f32 %v918_v53, %v635_v29 }
 0x18a   : > { %919 = vtanh.f32 %v646_v25  ;;  %v623_v4 = vadd.f32 %v622_v27, %v609_v28 }
 0x18c   : > { %v637_v34 = vadd.f32 %v636_v31, %v623_v4 }
 0x190   : > { %v920_v33 = vpop.eup %919 }
 0x191   : > { %v650_v35 = vmul.f32 %v920_v33, %v649_v26 }
 0x192   :  { %142 = sbr.rel (!%p140_p0) target bundleno = 162 (0xa2), region = 62 }
 0x193   : > { %v651_v36 = vadd.f32 %v650_v35, %v637_v34 }
 0x195   : > { %v652_v37 = vsel %vm148_vm1, %v651_v36, -100.0 }
 0x196   : > { %654 = vst [vmem:[%s653_s2] sm:$0xff] %v652_v37 }
 0x197   :  { %667 = dma.vmem_to_hbm [thread:$0]  %s660_s21, 256, %s662_s19, [#allocation8], %s1086_s11, %s1086_s11, %s1087_s12  }
 0x198   :  { %1077 = dma.done.wait [#allocation8], 256  }
 0x199   :  { %1078 = vsyncadd [#allocation8], 4294967040 }
 0x19a   :  { %672 = vsyncpa [#allocation7], 1 }
 0x19b   :  { %673 = vsyncpa [#allocation10], 1 }
 0x19c   :  { %674 = vsyncpa [#allocation13], 1 }
 0x19d   :  { %675 = vsyncpa [#allocation8], 1 }

</bundles_post_ra>
